<compile_context>
chip_gen: v7x
topology: tpu7x:2x2x1
jax: 0.10.0
libtpu: 0.0.40
codegen_flags: <defaults>
</compile_context>

<pallas_src>
import functools

import jax
import jax.numpy as jnp
from jax import lax
from jax.experimental import pallas as pl
from jax.experimental.pallas import tpu as pltpu


def _sigmoid_via_tanh(z):
    # sigmoid(z) == 0.5 * tanh(0.5 * z) + 0.5 ; single EUP op instead of exp+rcp.
    return 0.5 * jnp.tanh(0.5 * z) + 0.5


def _lstm_seq_kernel(xp_ref, m_ref, h0_ref, c0_ref, wh_ref, out_ref,
                     h_sc, c_sc, *, tt, hp):
    """One grid step = `tt` LSTM timesteps for one batch block.

    xp_ref : (tt, bb, 3Hp) f32   hoisted x@Wx + bias for this time chunk
    m_ref  : (tt, bb, 1)   f32   mask for this time chunk
    h0_ref : (bb, Hp)      f32   initial hidden state (resident)
    c0_ref : (bb, Hp)      f32   initial cell state   (resident)
    wh_ref : (Hp, 3Hp)     bf16  recurrent weight, gate-lane-aligned (resident)
    out_ref: (tt, bb, 2Hp) f32   [h | c] output slab for this time chunk
    h_sc/c_sc : (bb, Hp)   f32   VMEM scratch carrying the recurrent state
    """
    tb = pl.program_id(1)

    @pl.when(tb == 0)
    def _():
        h_sc[...] = h0_ref[...]
        c_sc[...] = c0_ref[...]

    def step(s, carry):
        h_prev = h_sc[...]                           # (bb, Hp) f32
        c_prev = c_sc[...]                           # (bb, Hp) f32

        # Recurrent projection only: h @ Wh (bf16 operands, f32 accumulate),
        # plus the precomputed x-projection (+bias) for this timestep.
        z = jnp.dot(h_prev.astype(jnp.bfloat16), wh_ref[...],
                    preferred_element_type=jnp.float32) + xp_ref[s]

        i_gate = _sigmoid_via_tanh(z[:, 0 * hp:1 * hp])
        j_gate = z[:, 1 * hp:2 * hp]
        o_gate = z[:, 2 * hp:3 * hp]

        c_new = (1.0 - i_gate) * c_prev + i_gate * jnp.tanh(j_gate)
        mb = jnp.broadcast_to(m_ref[s], c_new.shape)  # one broadcast, used twice
        c_new = mb * c_new
        h_new = mb * (jnp.tanh(c_new) * _sigmoid_via_tanh(o_gate))

        h_sc[...] = h_new
        c_sc[...] = c_new
        out_ref[s] = jnp.concatenate([h_new, c_new], axis=-1)  # lane-aligned slab
        return carry

    lax.fori_loop(0, tt, step, 0, unroll=True)


def _round_up(n, m):
    return ((n + m - 1) // m) * m


def my_lstm_seq(x, mask, h0, c0, weight, bias, *, block_b=None, block_t=8):
    """Run MyLSTMCell over a sequence.

    x: (T,B,D) f32, mask: (T,B,1) f32, h0/c0: (B,H) f32,
    weight: (3H, D+H) f32 (= Linear.weight), bias: (3H,) f32.
    Returns (h_seq, c_seq): each (T, B, H) f32.
    """
    T, B, D = x.shape
    H = h0.shape[-1]
    assert weight.shape == (3 * H, D + H)
    assert bias.shape == (3 * H,)

    Hp = _round_up(H, 128)                     # lane-aligned hidden width

    bb = B if block_b is None else block_b     # v7x: pass block_b=B//2 for 2 TCs
    assert B % bb == 0 and (bb == B or bb % 8 == 0)
    nb = B // bb

    tt = min(block_t, T)
    assert T % tt == 0
    nt = T // tt

    # --- weight / bias layout: split Linear.weight, gate-lane-align columns ---
    wx = weight[:, :D].T                       # (D, 3H)
    wh = weight[:, D:].T                       # (H, 3H)

    def pad_gate_cols(w):                      # (rows, 3H) -> (rows, 3Hp)
        rows = w.shape[0]
        out = jnp.zeros((rows, 3 * Hp), w.dtype)
        for g in range(3):
            out = out.at[:, g * Hp:g * Hp + H].set(w[:, g * H:(g + 1) * H])
        return out

    wx_p = pad_gate_cols(wx).astype(jnp.bfloat16)                     # (D, 3Hp)
    wh_p = (jnp.zeros((Hp, 3 * Hp), jnp.float32)
            .at[:H].set(pad_gate_cols(wh))
            .astype(jnp.bfloat16))                                    # (Hp, 3Hp)
    b_p = pad_gate_cols(bias.reshape(1, 3 * H))                       # (1, 3Hp)

    # --- hoisted input projection: one big matmul over all timesteps ---------
    xproj = (jnp.dot(x.reshape(T * B, D).astype(jnp.bfloat16), wx_p,
                     preferred_element_type=jnp.float32) + b_p
             ).reshape(T, B, 3 * Hp)

    h0_p = jnp.zeros((B, Hp), jnp.float32).at[:, :H].set(h0)
    c0_p = jnp.zeros((B, Hp), jnp.float32).at[:, :H].set(c0)

    cost = pl.CostEstimate(
        flops=T * (2 * B * Hp * 3 * Hp + 12 * B * Hp),
        transcendentals=T * B * Hp * 4,
        bytes_accessed=(xproj.size + mask.size + h0_p.size + c0_p.size
                        + T * B * 2 * Hp) * 4 + wh_p.size * 2,
    )

    kernel = functools.partial(_lstm_seq_kernel, tt=tt, hp=Hp)

    out = pl.pallas_call(
        kernel,
        out_shape=jax.ShapeDtypeStruct((T, B, 2 * Hp), jnp.float32),
        grid=(nb, nt),
        in_specs=[
            pl.BlockSpec((tt, bb, 3 * Hp), lambda b, t: (t, b, 0)),   # x-proj chunk
            pl.BlockSpec((tt, bb, 1), lambda b, t: (t, b, 0)),        # mask chunk
            pl.BlockSpec((bb, Hp), lambda b, t: (b, 0)),              # h0 (resident)
            pl.BlockSpec((bb, Hp), lambda b, t: (b, 0)),              # c0 (resident)
            pl.BlockSpec((Hp, 3 * Hp), lambda b, t: (0, 0)),          # Wh (resident)
        ],
        out_specs=pl.BlockSpec((tt, bb, 2 * Hp), lambda b, t: (t, b, 0)),
        scratch_shapes=[pltpu.VMEM((bb, Hp), jnp.float32),            # h carry
                        pltpu.VMEM((bb, Hp), jnp.float32)],           # c carry
        compiler_params=pltpu.CompilerParams(
            dimension_semantics=("parallel", "arbitrary"),
            vmem_limit_bytes=32 * 1024 * 1024),
        cost_estimate=cost,
    )(xproj, mask, h0_p, c0_p, wh_p)

    return out[:, :, :H], out[:, :, Hp:Hp + H]


def my_lstm_cell(x, mask, h, c, weight, bias):
    """Single MyLSTMCell.forward step (dropout = identity): T = 1 sequence."""
    h_seq, c_seq = my_lstm_seq(x[None], mask[None], h, c, weight, bias,
                               block_t=1)
    return h_seq[0], c_seq[0]


# ----------------------------- references ---------------------------------

def block_orth_normal_weight(key, input_size, hidden_size):
    """Deterministic analogue of block_orth_normal_initializer:
    three (H, D+H) blocks with orthonormal rows, stacked -> (3H, D+H)."""
    in_dim = input_size + hidden_size
    blocks = []
    for k in jax.random.split(key, 3):
        a = jax.random.normal(k, (in_dim, in_dim), dtype=jnp.float32)
        q, _ = jnp.linalg.qr(a)
        blocks.append(q[:hidden_size, :])
    return jnp.concatenate(blocks, axis=0)


def reference_cell(x, mask, h, c, weight, bias):
    """Pure-JAX mirror of the PyTorch forward (same bf16 matmul operands)."""
    D = x.shape[-1]
    H = h.shape[-1]
    wx = weight[:, :D].T.astype(jnp.bfloat16)
    wh = weight[:, D:].T.astype(jnp.bfloat16)
    z = (jnp.dot(x.astype(jnp.bfloat16), wx, preferred_element_type=jnp.float32)
         + jnp.dot(h.astype(jnp.bfloat16), wh, preferred_element_type=jnp.float32)
         + bias[None, :])
    i = jax.nn.sigmoid(z[:, :H])
    j = z[:, H:2 * H]
    o = z[:, 2 * H:]
    c_new = mask * ((1.0 - i) * c + i * jnp.tanh(j))
    h_new = mask * (jnp.tanh(c_new) * jax.nn.sigmoid(o))
    return h_new, c_new


def reference_seq(x, mask, h0, c0, weight, bias):
    def step(carry, xt_mt):
        h, c = carry
        xt, mt = xt_mt
        h, c = reference_cell(xt, mt, h, c, weight, bias)
        return (h, c), (h, c)
    _, (h_seq, c_seq) = jax.lax.scan(step, (h0, c0), (x, mask))
    return h_seq, c_seq


if __name__ == "__main__":
    T, B, D, H = 16, 8, 16, 32   # seq_len, batch, input_size, hidden_size

    key = jax.random.PRNGKey(0)
    kx, kh, kc, km, kw = jax.random.split(key, 5)

    x = jax.random.normal(kx, (T, B, D), dtype=jnp.float32)
    h0 = jax.random.normal(kh, (B, H), dtype=jnp.float32)
    c0 = jax.random.normal(kc, (B, H), dtype=jnp.float32)
    # per-step masks in {0., 1.}, as produced by pack_padded_sequence-style code
    mask = (jax.random.uniform(km, (T, B, 1)) > 0.25).astype(jnp.float32)

    weight = block_orth_normal_weight(kw, D, H)        # (3H, D+H), like Linear.weight
    bias = jnp.zeros((3 * H,), dtype=jnp.float32)      # constant 0.0 init (spec)

    # Full-sequence kernel (time chunked into blocks of 8 steps).
    h_seq, c_seq = my_lstm_seq(x, mask, h0, c0, weight, bias, block_t=8)
    jax.block_until_ready((h_seq, c_seq))

    h_ref, c_ref = reference_seq(x, mask, h0, c0, weight, bias)
    assert jnp.allclose(h_seq, h_ref, atol=1e-2, rtol=1e-2), "h_seq mismatch"
    assert jnp.allclose(c_seq, c_ref, atol=1e-2, rtol=1e-2), "c_seq mismatch"

    # Single-step cell (the module's forward exactly, dropout = identity).
    h1, c1 = my_lstm_cell(x[0], mask[0], h0, c0, weight, bias)
    jax.block_until_ready((h1, c1))
    h1_ref, c1_ref = reference_cell(x[0], mask[0], h0, c0, weight, bias)
    assert jnp.allclose(h1, h1_ref, atol=1e-2, rtol=1e-2), "h cell mismatch"
    assert jnp.allclose(c1, c1_ref, atol=1e-2, rtol=1e-2), "c cell mismatch"

    print("KERNEL_OK")
</pallas_src>

<mosaic_0001>
module attributes {stable_mosaic.version = 11 : i64} {
  func.func @_lstm_seq_kernel(%arg0: i32, %arg1: i32, %arg2: memref<8x8x384xf32, #tpu.memory_space<vmem>>, %arg3: memref<8x8x1xf32, #tpu.memory_space<vmem>>, %arg4: memref<8x128xf32, #tpu.memory_space<vmem>>, %arg5: memref<8x128xf32, #tpu.memory_space<vmem>>, %arg6: memref<128x384xbf16, #tpu.memory_space<vmem>>, %arg7: memref<8x8x256xf32, #tpu.memory_space<vmem>>, %arg8: memref<8x128xf32, #tpu.memory_space<vmem>>, %arg9: memref<8x128xf32, #tpu.memory_space<vmem>>) attributes {dimension_semantics = [#tpu.dimension_semantics<parallel>, #tpu.dimension_semantics<arbitrary>], iteration_bounds = array<i64: 1, 2>, scalar_prefetch = 0 : i64, scratch_operands = 2 : i64, tpu.core_type = #tpu.core_type<tc>, window_params = [{transform_indices = @transform_0, window_bounds = array<i64: 8, 8, 384>}, {transform_indices = @transform_1, window_bounds = array<i64: 8, 8, 1>}, {transform_indices = @transform_2, window_bounds = array<i64: 8, 128>}, {transform_indices = @transform_3, window_bounds = array<i64: 8, 128>}, {pipeline_mode = #tpu.pipeline_mode<synchronous>, transform_indices = @transform_4, window_bounds = array<i64: 128, 384>}, {transform_indices = @transform_5, window_bounds = array<i64: 8, 8, 256>}]} {
    %c0_i32 = arith.constant 0 : i32
    %0 = arith.cmpi eq, %arg1, %c0_i32 : i32
    %1 = arith.extui %0 : i1 to i32
    %c0_i32_0 = arith.constant 0 : i32
    %2 = arith.cmpi ne, %1, %c0_i32_0 : i32
    scf.if %2 {
      %c0_192 = arith.constant 0 : index
      %c0_193 = arith.constant 0 : index
      %387 = vector.load %arg4[%c0_192, %c0_193] : memref<8x128xf32, #tpu.memory_space<vmem>>, vector<8x128xf32>
      %c0_194 = arith.constant 0 : index
      %c0_195 = arith.constant 0 : index
      %388 = vector.load %arg8[%c0_194, %c0_195] : memref<8x128xf32, #tpu.memory_space<vmem>>, vector<8x128xf32>
      tpu.vector_store %arg8[%c0_194, %c0_195], %387 {strides = array<i32>} : memref<8x128xf32, #tpu.memory_space<vmem>>, vector<8x128xf32>,
      %c0_196 = arith.constant 0 : index
      %c0_197 = arith.constant 0 : index
      %389 = vector.load %arg5[%c0_196, %c0_197] : memref<8x128xf32, #tpu.memory_space<vmem>>, vector<8x128xf32>
      %c0_198 = arith.constant 0 : index
      %c0_199 = arith.constant 0 : index
      %390 = vector.load %arg9[%c0_198, %c0_199] : memref<8x128xf32, #tpu.memory_space<vmem>>, vector<8x128xf32>
      tpu.vector_store %arg9[%c0_198, %c0_199], %389 {strides = array<i32>} : memref<8x128xf32, #tpu.memory_space<vmem>>, vector<8x128xf32>,
    } else {
    }
    %c0_i32_1 = arith.constant 0 : i32
    %c0 = arith.constant 0 : index
    %c0_2 = arith.constant 0 : index
    %3 = vector.load %arg8[%c0, %c0_2] : memref<8x128xf32, #tpu.memory_space<vmem>>, vector<8x128xf32>
    %c0_3 = arith.constant 0 : index
    %c0_4 = arith.constant 0 : index
    %4 = vector.load %arg9[%c0_3, %c0_4] : memref<8x128xf32, #tpu.memory_space<vmem>>, vector<8x128xf32>
    %5 = arith.truncf %3 : vector<8x128xf32> to vector<8x128xbf16>
    %c0_5 = arith.constant 0 : index
    %c0_6 = arith.constant 0 : index
    %6 = vector.load %arg6[%c0_5, %c0_6] : memref<128x384xbf16, #tpu.memory_space<vmem>>, vector<128x384xbf16>
    %cst = arith.constant dense<0.000000e+00> : vector<8x384xf32>
    %7 = tpu.matmul %5, %6, %cst {dimension_numbers = #tpu.dot_dimension_numbers<[1], [0], [0], [1], [0, 0, 1, 1], [], []>} : vector<8x128xbf16>, vector<128x384xbf16>, vector<8x384xf32> -> vector<8x384xf32>
    %8 = arith.index_cast %c0_i32_1 : i32 to index
    %c0_7 = arith.constant 0 : index
    %c0_8 = arith.constant 0 : index
    %9 = vector.load %arg2[%8, %c0_7, %c0_8] : memref<8x8x384xf32, #tpu.memory_space<vmem>>, vector<1x8x384xf32>
    %10 = vector.shape_cast %9 : vector<1x8x384xf32> to vector<8x384xf32>
    %11 = arith.addf %7, %10 : vector<8x384xf32>
    %12 = vector.extract_strided_slice %11 {offsets = [0, 0], sizes = [8, 128], strides = [1, 1]} : vector<8x384xf32> to vector<8x128xf32>
    %cst_9 = arith.constant 5.000000e-01 : f32
    %13 = vector.broadcast %cst_9 : f32 to vector<8x128xf32>
    %14 = arith.mulf %13, %12 : vector<8x128xf32>
    %15 = math.tanh %14 : vector<8x128xf32>
    %cst_10 = arith.constant 5.000000e-01 : f32
    %16 = vector.broadcast %cst_10 : f32 to vector<8x128xf32>
    %17 = arith.mulf %16, %15 : vector<8x128xf32>
    %cst_11 = arith.constant 5.000000e-01 : f32
    %18 = vector.broadcast %cst_11 : f32 to vector<8x128xf32>
    %19 = arith.addf %17, %18 : vector<8x128xf32>
    %20 = vector.extract_strided_slice %11 {offsets = [0, 128], sizes = [8, 128], strides = [1, 1]} : vector<8x384xf32> to vector<8x128xf32>
    %21 = vector.extract_strided_slice %11 {offsets = [0, 256], sizes = [8, 128], strides = [1, 1]} : vector<8x384xf32> to vector<8x128xf32>
    %cst_12 = arith.constant 1.000000e+00 : f32
    %22 = vector.broadcast %cst_12 : f32 to vector<8x128xf32>
    %23 = arith.subf %22, %19 : vector<8x128xf32>
    %24 = arith.mulf %23, %4 : vector<8x128xf32>
    %25 = math.tanh %20 : vector<8x128xf32>
    %26 = arith.mulf %19, %25 : vector<8x128xf32>
    %27 = arith.addf %24, %26 : vector<8x128xf32>
    %28 = arith.index_cast %c0_i32_1 : i32 to index
    %c0_13 = arith.constant 0 : index
    %c0_14 = arith.constant 0 : index
    %29 = vector.load %arg3[%28, %c0_13, %c0_14] : memref<8x8x1xf32, #tpu.memory_space<vmem>>, vector<1x8x1xf32>
    %30 = vector.shape_cast %29 : vector<1x8x1xf32> to vector<8x1xf32>
    %31 = vector.shape_cast %30 : vector<8x1xf32> to vector<8x1xf32>
    %32 = vector.broadcast %31 : vector<8x1xf32> to vector<8x128xf32>
    %33 = arith.mulf %32, %27 : vector<8x128xf32>
    %34 = math.tanh %33 : vector<8x128xf32>
    %cst_15 = arith.constant 5.000000e-01 : f32
    %35 = vector.broadcast %cst_15 : f32 to vector<8x128xf32>
    %36 = arith.mulf %35, %21 : vector<8x128xf32>
    %37 = math.tanh %36 : vector<8x128xf32>
    %cst_16 = arith.constant 5.000000e-01 : f32
    %38 = vector.broadcast %cst_16 : f32 to vector<8x128xf32>
    %39 = arith.mulf %38, %37 : vector<8x128xf32>
    %cst_17 = arith.constant 5.000000e-01 : f32
    %40 = vector.broadcast %cst_17 : f32 to vector<8x128xf32>
    %41 = arith.addf %39, %40 : vector<8x128xf32>
    %42 = arith.mulf %34, %41 : vector<8x128xf32>
    %43 = arith.mulf %32, %42 : vector<8x128xf32>
    %c0_18 = arith.constant 0 : index
    %c0_19 = arith.constant 0 : index
    %44 = vector.load %arg8[%c0_18, %c0_19] : memref<8x128xf32, #tpu.memory_space<vmem>>, vector<8x128xf32>
    tpu.vector_store %arg8[%c0_18, %c0_19], %43 {strides = array<i32>} : memref<8x128xf32, #tpu.memory_space<vmem>>, vector<8x128xf32>,
    %c0_20 = arith.constant 0 : index
    %c0_21 = arith.constant 0 : index
    %45 = vector.load %arg9[%c0_20, %c0_21] : memref<8x128xf32, #tpu.memory_space<vmem>>, vector<8x128xf32>
    tpu.vector_store %arg9[%c0_20, %c0_21], %33 {strides = array<i32>} : memref<8x128xf32, #tpu.memory_space<vmem>>, vector<8x128xf32>,
    %46 = tpu.concatenate %43, %33 in 1 : vector<8x128xf32>, vector<8x128xf32> -> vector<8x256xf32>
    %47 = arith.index_cast %c0_i32_1 : i32 to index
    %c0_22 = arith.constant 0 : index
    %c0_23 = arith.constant 0 : index
    %48 = vector.load %arg7[%47, %c0_22, %c0_23] : memref<8x8x256xf32, #tpu.memory_space<vmem>>, vector<1x8x256xf32>
    %49 = vector.shape_cast %48 : vector<1x8x256xf32> to vector<8x256xf32>
    %50 = vector.shape_cast %46 : vector<8x256xf32> to vector<1x8x256xf32>
    tpu.vector_store %arg7[%47, %c0_22, %c0_23], %50 {strides = array<i32>} : memref<8x8x256xf32, #tpu.memory_space<vmem>>, vector<1x8x256xf32>,
    %c1_i32 = arith.constant 1 : i32
    %c0_24 = arith.constant 0 : index
    %c0_25 = arith.constant 0 : index
    %51 = vector.load %arg8[%c0_24, %c0_25] : memref<8x128xf32, #tpu.memory_space<vmem>>, vector<8x128xf32>
    %c0_26 = arith.constant 0 : index
    %c0_27 = arith.constant 0 : index
    %52 = vector.load %arg9[%c0_26, %c0_27] : memref<8x128xf32, #tpu.memory_space<vmem>>, vector<8x128xf32>
    %53 = arith.truncf %51 : vector<8x128xf32> to vector<8x128xbf16>
    %c0_28 = arith.constant 0 : index
    %c0_29 = arith.constant 0 : index
    %54 = vector.load %arg6[%c0_28, %c0_29] : memref<128x384xbf16, #tpu.memory_space<vmem>>, vector<128x384xbf16>
    %cst_30 = arith.constant dense<0.000000e+00> : vector<8x384xf32>
    %55 = tpu.matmul %53, %54, %cst_30 {dimension_numbers = #tpu.dot_dimension_numbers<[1], [0], [0], [1], [0, 0, 1, 1], [], []>} : vector<8x128xbf16>, vector<128x384xbf16>, vector<8x384xf32> -> vector<8x384xf32>
    %56 = arith.index_cast %c1_i32 : i32 to index
    %c0_31 = arith.constant 0 : index
    %c0_32 = arith.constant 0 : index
    %57 = vector.load %arg2[%56, %c0_31, %c0_32] : memref<8x8x384xf32, #tpu.memory_space<vmem>>, vector<1x8x384xf32>
    %58 = vector.shape_cast %57 : vector<1x8x384xf32> to vector<8x384xf32>
    %59 = arith.addf %55, %58 : vector<8x384xf32>
    %60 = vector.extract_strided_slice %59 {offsets = [0, 0], sizes = [8, 128], strides = [1, 1]} : vector<8x384xf32> to vector<8x128xf32>
    %cst_33 = arith.constant 5.000000e-01 : f32
    %61 = vector.broadcast %cst_33 : f32 to vector<8x128xf32>
    %62 = arith.mulf %61, %60 : vector<8x128xf32>
    %63 = math.tanh %62 : vector<8x128xf32>
    %cst_34 = arith.constant 5.000000e-01 : f32
    %64 = vector.broadcast %cst_34 : f32 to vector<8x128xf32>
    %65 = arith.mulf %64, %63 : vector<8x128xf32>
    %cst_35 = arith.constant 5.000000e-01 : f32
    %66 = vector.broadcast %cst_35 : f32 to vector<8x128xf32>
    %67 = arith.addf %65, %66 : vector<8x128xf32>
    %68 = vector.extract_strided_slice %59 {offsets = [0, 128], sizes = [8, 128], strides = [1, 1]} : vector<8x384xf32> to vector<8x128xf32>
    %69 = vector.extract_strided_slice %59 {offsets = [0, 256], sizes = [8, 128], strides = [1, 1]} : vector<8x384xf32> to vector<8x128xf32>
    %cst_36 = arith.constant 1.000000e+00 : f32
    %70 = vector.broadcast %cst_36 : f32 to vector<8x128xf32>
    %71 = arith.subf %70, %67 : vector<8x128xf32>
    %72 = arith.mulf %71, %52 : vector<8x128xf32>
    %73 = math.tanh %68 : vector<8x128xf32>
    %74 = arith.mulf %67, %73 : vector<8x128xf32>
    %75 = arith.addf %72, %74 : vector<8x128xf32>
    %76 = arith.index_cast %c1_i32 : i32 to index
    %c0_37 = arith.constant 0 : index
    %c0_38 = arith.constant 0 : index
    %77 = vector.load %arg3[%76, %c0_37, %c0_38] : memref<8x8x1xf32, #tpu.memory_space<vmem>>, vector<1x8x1xf32>
    %78 = vector.shape_cast %77 : vector<1x8x1xf32> to vector<8x1xf32>
    %79 = vector.shape_cast %78 : vector<8x1xf32> to vector<8x1xf32>
    %80 = vector.broadcast %79 : vector<8x1xf32> to vector<8x128xf32>
    %81 = arith.mulf %80, %75 : vector<8x128xf32>
    %82 = math.tanh %81 : vector<8x128xf32>
    %cst_39 = arith.constant 5.000000e-01 : f32
    %83 = vector.broadcast %cst_39 : f32 to vector<8x128xf32>
    %84 = arith.mulf %83, %69 : vector<8x128xf32>
    %85 = math.tanh %84 : vector<8x128xf32>
    %cst_40 = arith.constant 5.000000e-01 : f32
    %86 = vector.broadcast %cst_40 : f32 to vector<8x128xf32>
    %87 = arith.mulf %86, %85 : vector<8x128xf32>
    %cst_41 = arith.constant 5.000000e-01 : f32
    %88 = vector.broadcast %cst_41 : f32 to vector<8x128xf32>
    %89 = arith.addf %87, %88 : vector<8x128xf32>
    %90 = arith.mulf %82, %89 : vector<8x128xf32>
    %91 = arith.mulf %80, %90 : vector<8x128xf32>
    %c0_42 = arith.constant 0 : index
    %c0_43 = arith.constant 0 : index
    %92 = vector.load %arg8[%c0_42, %c0_43] : memref<8x128xf32, #tpu.memory_space<vmem>>, vector<8x128xf32>
    tpu.vector_store %arg8[%c0_42, %c0_43], %91 {strides = array<i32>} : memref<8x128xf32, #tpu.memory_space<vmem>>, vector<8x128xf32>,
    %c0_44 = arith.constant 0 : index
    %c0_45 = arith.constant 0 : index
    %93 = vector.load %arg9[%c0_44, %c0_45] : memref<8x128xf32, #tpu.memory_space<vmem>>, vector<8x128xf32>
    tpu.vector_store %arg9[%c0_44, %c0_45], %81 {strides = array<i32>} : memref<8x128xf32, #tpu.memory_space<vmem>>, vector<8x128xf32>,
    %94 = tpu.concatenate %91, %81 in 1 : vector<8x128xf32>, vector<8x128xf32> -> vector<8x256xf32>
    %95 = arith.index_cast %c1_i32 : i32 to index
    %c0_46 = arith.constant 0 : index
    %c0_47 = arith.constant 0 : index
    %96 = vector.load %arg7[%95, %c0_46, %c0_47] : memref<8x8x256xf32, #tpu.memory_space<vmem>>, vector<1x8x256xf32>
    %97 = vector.shape_cast %96 : vector<1x8x256xf32> to vector<8x256xf32>
    %98 = vector.shape_cast %94 : vector<8x256xf32> to vector<1x8x256xf32>
    tpu.vector_store %arg7[%95, %c0_46, %c0_47], %98 {strides = array<i32>} : memref<8x8x256xf32, #tpu.memory_space<vmem>>, vector<1x8x256xf32>,
    %c2_i32 = arith.constant 2 : i32
    %c0_48 = arith.constant 0 : index
    %c0_49 = arith.constant 0 : index
    %99 = vector.load %arg8[%c0_48, %c0_49] : memref<8x128xf32, #tpu.memory_space<vmem>>, vector<8x128xf32>
    %c0_50 = arith.constant 0 : index
    %c0_51 = arith.constant 0 : index
    %100 = vector.load %arg9[%c0_50, %c0_51] : memref<8x128xf32, #tpu.memory_space<vmem>>, vector<8x128xf32>
    %101 = arith.truncf %99 : vector<8x128xf32> to vector<8x128xbf16>
    %c0_52 = arith.constant 0 : index
    %c0_53 = arith.constant 0 : index
    %102 = vector.load %arg6[%c0_52, %c0_53] : memref<128x384xbf16, #tpu.memory_space<vmem>>, vector<128x384xbf16>
    %cst_54 = arith.constant dense<0.000000e+00> : vector<8x384xf32>
    %103 = tpu.matmul %101, %102, %cst_54 {dimension_numbers = #tpu.dot_dimension_numbers<[1], [0], [0], [1], [0, 0, 1, 1], [], []>} : vector<8x128xbf16>, vector<128x384xbf16>, vector<8x384xf32> -> vector<8x384xf32>
    %104 = arith.index_cast %c2_i32 : i32 to index
    %c0_55 = arith.constant 0 : index
    %c0_56 = arith.constant 0 : index
    %105 = vector.load %arg2[%104, %c0_55, %c0_56] : memref<8x8x384xf32, #tpu.memory_space<vmem>>, vector<1x8x384xf32>
    %106 = vector.shape_cast %105 : vector<1x8x384xf32> to vector<8x384xf32>
    %107 = arith.addf %103, %106 : vector<8x384xf32>
    %108 = vector.extract_strided_slice %107 {offsets = [0, 0], sizes = [8, 128], strides = [1, 1]} : vector<8x384xf32> to vector<8x128xf32>
    %cst_57 = arith.constant 5.000000e-01 : f32
    %109 = vector.broadcast %cst_57 : f32 to vector<8x128xf32>
    %110 = arith.mulf %109, %108 : vector<8x128xf32>
    %111 = math.tanh %110 : vector<8x128xf32>
    %cst_58 = arith.constant 5.000000e-01 : f32
    %112 = vector.broadcast %cst_58 : f32 to vector<8x128xf32>
    %113 = arith.mulf %112, %111 : vector<8x128xf32>
    %cst_59 = arith.constant 5.000000e-01 : f32
    %114 = vector.broadcast %cst_59 : f32 to vector<8x128xf32>
    %115 = arith.addf %113, %114 : vector<8x128xf32>
    %116 = vector.extract_strided_slice %107 {offsets = [0, 128], sizes = [8, 128], strides = [1, 1]} : vector<8x384xf32> to vector<8x128xf32>
    %117 = vector.extract_strided_slice %107 {offsets = [0, 256], sizes = [8, 128], strides = [1, 1]} : vector<8x384xf32> to vector<8x128xf32>
    %cst_60 = arith.constant 1.000000e+00 : f32
    %118 = vector.broadcast %cst_60 : f32 to vector<8x128xf32>
    %119 = arith.subf %118, %115 : vector<8x128xf32>
    %120 = arith.mulf %119, %100 : vector<8x128xf32>
    %121 = math.tanh %116 : vector<8x128xf32>
    %122 = arith.mulf %115, %121 : vector<8x128xf32>
    %123 = arith.addf %120, %122 : vector<8x128xf32>
    %124 = arith.index_cast %c2_i32 : i32 to index
    %c0_61 = arith.constant 0 : index
    %c0_62 = arith.constant 0 : index
    %125 = vector.load %arg3[%124, %c0_61, %c0_62] : memref<8x8x1xf32, #tpu.memory_space<vmem>>, vector<1x8x1xf32>
    %126 = vector.shape_cast %125 : vector<1x8x1xf32> to vector<8x1xf32>
    %127 = vector.shape_cast %126 : vector<8x1xf32> to vector<8x1xf32>
    %128 = vector.broadcast %127 : vector<8x1xf32> to vector<8x128xf32>
    %129 = arith.mulf %128, %123 : vector<8x128xf32>
    %130 = math.tanh %129 : vector<8x128xf32>
    %cst_63 = arith.constant 5.000000e-01 : f32
    %131 = vector.broadcast %cst_63 : f32 to vector<8x128xf32>
    %132 = arith.mulf %131, %117 : vector<8x128xf32>
    %133 = math.tanh %132 : vector<8x128xf32>
    %cst_64 = arith.constant 5.000000e-01 : f32
    %134 = vector.broadcast %cst_64 : f32 to vector<8x128xf32>
    %135 = arith.mulf %134, %133 : vector<8x128xf32>
    %cst_65 = arith.constant 5.000000e-01 : f32
    %136 = vector.broadcast %cst_65 : f32 to vector<8x128xf32>
    %137 = arith.addf %135, %136 : vector<8x128xf32>
    %138 = arith.mulf %130, %137 : vector<8x128xf32>
    %139 = arith.mulf %128, %138 : vector<8x128xf32>
    %c0_66 = arith.constant 0 : index
    %c0_67 = arith.constant 0 : index
    %140 = vector.load %arg8[%c0_66, %c0_67] : memref<8x128xf32, #tpu.memory_space<vmem>>, vector<8x128xf32>
    tpu.vector_store %arg8[%c0_66, %c0_67], %139 {strides = array<i32>} : memref<8x128xf32, #tpu.memory_space<vmem>>, vector<8x128xf32>,
    %c0_68 = arith.constant 0 : index
    %c0_69 = arith.constant 0 : index
    %141 = vector.load %arg9[%c0_68, %c0_69] : memref<8x128xf32, #tpu.memory_space<vmem>>, vector<8x128xf32>
    tpu.vector_store %arg9[%c0_68, %c0_69], %129 {strides = array<i32>} : memref<8x128xf32, #tpu.memory_space<vmem>>, vector<8x128xf32>,
    %142 = tpu.concatenate %139, %129 in 1 : vector<8x128xf32>, vector<8x128xf32> -> vector<8x256xf32>
    %143 = arith.index_cast %c2_i32 : i32 to index
    %c0_70 = arith.constant 0 : index
    %c0_71 = arith.constant 0 : index
    %144 = vector.load %arg7[%143, %c0_70, %c0_71] : memref<8x8x256xf32, #tpu.memory_space<vmem>>, vector<1x8x256xf32>
    %145 = vector.shape_cast %144 : vector<1x8x256xf32> to vector<8x256xf32>
    %146 = vector.shape_cast %142 : vector<8x256xf32> to vector<1x8x256xf32>
    tpu.vector_store %arg7[%143, %c0_70, %c0_71], %146 {strides = array<i32>} : memref<8x8x256xf32, #tpu.memory_space<vmem>>, vector<1x8x256xf32>,
    %c3_i32 = arith.constant 3 : i32
    %c0_72 = arith.constant 0 : index
    %c0_73 = arith.constant 0 : index
    %147 = vector.load %arg8[%c0_72, %c0_73] : memref<8x128xf32, #tpu.memory_space<vmem>>, vector<8x128xf32>
    %c0_74 = arith.constant 0 : index
    %c0_75 = arith.constant 0 : index
    %148 = vector.load %arg9[%c0_74, %c0_75] : memref<8x128xf32, #tpu.memory_space<vmem>>, vector<8x128xf32>
    %149 = arith.truncf %147 : vector<8x128xf32> to vector<8x128xbf16>
    %c0_76 = arith.constant 0 : index
    %c0_77 = arith.constant 0 : index
    %150 = vector.load %arg6[%c0_76, %c0_77] : memref<128x384xbf16, #tpu.memory_space<vmem>>, vector<128x384xbf16>
    %cst_78 = arith.constant dense<0.000000e+00> : vector<8x384xf32>
    %151 = tpu.matmul %149, %150, %cst_78 {dimension_numbers = #tpu.dot_dimension_numbers<[1], [0], [0], [1], [0, 0, 1, 1], [], []>} : vector<8x128xbf16>, vector<128x384xbf16>, vector<8x384xf32> -> vector<8x384xf32>
    %152 = arith.index_cast %c3_i32 : i32 to index
    %c0_79 = arith.constant 0 : index
    %c0_80 = arith.constant 0 : index
    %153 = vector.load %arg2[%152, %c0_79, %c0_80] : memref<8x8x384xf32, #tpu.memory_space<vmem>>, vector<1x8x384xf32>
    %154 = vector.shape_cast %153 : vector<1x8x384xf32> to vector<8x384xf32>
    %155 = arith.addf %151, %154 : vector<8x384xf32>
    %156 = vector.extract_strided_slice %155 {offsets = [0, 0], sizes = [8, 128], strides = [1, 1]} : vector<8x384xf32> to vector<8x128xf32>
    %cst_81 = arith.constant 5.000000e-01 : f32
    %157 = vector.broadcast %cst_81 : f32 to vector<8x128xf32>
    %158 = arith.mulf %157, %156 : vector<8x128xf32>
    %159 = math.tanh %158 : vector<8x128xf32>
    %cst_82 = arith.constant 5.000000e-01 : f32
    %160 = vector.broadcast %cst_82 : f32 to vector<8x128xf32>
    %161 = arith.mulf %160, %159 : vector<8x128xf32>
    %cst_83 = arith.constant 5.000000e-01 : f32
    %162 = vector.broadcast %cst_83 : f32 to vector<8x128xf32>
    %163 = arith.addf %161, %162 : vector<8x128xf32>
    %164 = vector.extract_strided_slice %155 {offsets = [0, 128], sizes = [8, 128], strides = [1, 1]} : vector<8x384xf32> to vector<8x128xf32>
    %165 = vector.extract_strided_slice %155 {offsets = [0, 256], sizes = [8, 128], strides = [1, 1]} : vector<8x384xf32> to vector<8x128xf32>
    %cst_84 = arith.constant 1.000000e+00 : f32
    %166 = vector.broadcast %cst_84 : f32 to vector<8x128xf32>
    %167 = arith.subf %166, %163 : vector<8x128xf32>
    %168 = arith.mulf %167, %148 : vector<8x128xf32>
    %169 = math.tanh %164 : vector<8x128xf32>
    %170 = arith.mulf %163, %169 : vector<8x128xf32>
    %171 = arith.addf %168, %170 : vector<8x128xf32>
    %172 = arith.index_cast %c3_i32 : i32 to index
    %c0_85 = arith.constant 0 : index
    %c0_86 = arith.constant 0 : index
    %173 = vector.load %arg3[%172, %c0_85, %c0_86] : memref<8x8x1xf32, #tpu.memory_space<vmem>>, vector<1x8x1xf32>
    %174 = vector.shape_cast %173 : vector<1x8x1xf32> to vector<8x1xf32>
    %175 = vector.shape_cast %174 : vector<8x1xf32> to vector<8x1xf32>
    %176 = vector.broadcast %175 : vector<8x1xf32> to vector<8x128xf32>
    %177 = arith.mulf %176, %171 : vector<8x128xf32>
    %178 = math.tanh %177 : vector<8x128xf32>
    %cst_87 = arith.constant 5.000000e-01 : f32
    %179 = vector.broadcast %cst_87 : f32 to vector<8x128xf32>
    %180 = arith.mulf %179, %165 : vector<8x128xf32>
    %181 = math.tanh %180 : vector<8x128xf32>
    %cst_88 = arith.constant 5.000000e-01 : f32
    %182 = vector.broadcast %cst_88 : f32 to vector<8x128xf32>
    %183 = arith.mulf %182, %181 : vector<8x128xf32>
    %cst_89 = arith.constant 5.000000e-01 : f32
    %184 = vector.broadcast %cst_89 : f32 to vector<8x128xf32>
    %185 = arith.addf %183, %184 : vector<8x128xf32>
    %186 = arith.mulf %178, %185 : vector<8x128xf32>
    %187 = arith.mulf %176, %186 : vector<8x128xf32>
    %c0_90 = arith.constant 0 : index
    %c0_91 = arith.constant 0 : index
    %188 = vector.load %arg8[%c0_90, %c0_91] : memref<8x128xf32, #tpu.memory_space<vmem>>, vector<8x128xf32>
    tpu.vector_store %arg8[%c0_90, %c0_91], %187 {strides = array<i32>} : memref<8x128xf32, #tpu.memory_space<vmem>>, vector<8x128xf32>,
    %c0_92 = arith.constant 0 : index
    %c0_93 = arith.constant 0 : index
    %189 = vector.load %arg9[%c0_92, %c0_93] : memref<8x128xf32, #tpu.memory_space<vmem>>, vector<8x128xf32>
    tpu.vector_store %arg9[%c0_92, %c0_93], %177 {strides = array<i32>} : memref<8x128xf32, #tpu.memory_space<vmem>>, vector<8x128xf32>,
    %190 = tpu.concatenate %187, %177 in 1 : vector<8x128xf32>, vector<8x128xf32> -> vector<8x256xf32>
    %191 = arith.index_cast %c3_i32 : i32 to index
    %c0_94 = arith.constant 0 : index
    %c0_95 = arith.constant 0 : index
    %192 = vector.load %arg7[%191, %c0_94, %c0_95] : memref<8x8x256xf32, #tpu.memory_space<vmem>>, vector<1x8x256xf32>
    %193 = vector.shape_cast %192 : vector<1x8x256xf32> to vector<8x256xf32>
    %194 = vector.shape_cast %190 : vector<8x256xf32> to vector<1x8x256xf32>
    tpu.vector_store %arg7[%191, %c0_94, %c0_95], %194 {strides = array<i32>} : memref<8x8x256xf32, #tpu.memory_space<vmem>>, vector<1x8x256xf32>,
    %c4_i32 = arith.constant 4 : i32
    %c0_96 = arith.constant 0 : index
    %c0_97 = arith.constant 0 : index
    %195 = vector.load %arg8[%c0_96, %c0_97] : memref<8x128xf32, #tpu.memory_space<vmem>>, vector<8x128xf32>
    %c0_98 = arith.constant 0 : index
    %c0_99 = arith.constant 0 : index
    %196 = vector.load %arg9[%c0_98, %c0_99] : memref<8x128xf32, #tpu.memory_space<vmem>>, vector<8x128xf32>
    %197 = arith.truncf %195 : vector<8x128xf32> to vector<8x128xbf16>
    %c0_100 = arith.constant 0 : index
    %c0_101 = arith.constant 0 : index
    %198 = vector.load %arg6[%c0_100, %c0_101] : memref<128x384xbf16, #tpu.memory_space<vmem>>, vector<128x384xbf16>
    %cst_102 = arith.constant dense<0.000000e+00> : vector<8x384xf32>
    %199 = tpu.matmul %197, %198, %cst_102 {dimension_numbers = #tpu.dot_dimension_numbers<[1], [0], [0], [1], [0, 0, 1, 1], [], []>} : vector<8x128xbf16>, vector<128x384xbf16>, vector<8x384xf32> -> vector<8x384xf32>
    %200 = arith.index_cast %c4_i32 : i32 to index
    %c0_103 = arith.constant 0 : index
    %c0_104 = arith.constant 0 : index
    %201 = vector.load %arg2[%200, %c0_103, %c0_104] : memref<8x8x384xf32, #tpu.memory_space<vmem>>, vector<1x8x384xf32>
    %202 = vector.shape_cast %201 : vector<1x8x384xf32> to vector<8x384xf32>
    %203 = arith.addf %199, %202 : vector<8x384xf32>
    %204 = vector.extract_strided_slice %203 {offsets = [0, 0], sizes = [8, 128], strides = [1, 1]} : vector<8x384xf32> to vector<8x128xf32>
    %cst_105 = arith.constant 5.000000e-01 : f32
    %205 = vector.broadcast %cst_105 : f32 to vector<8x128xf32>
    %206 = arith.mulf %205, %204 : vector<8x128xf32>
    %207 = math.tanh %206 : vector<8x128xf32>
    %cst_106 = arith.constant 5.000000e-01 : f32
    %208 = vector.broadcast %cst_106 : f32 to vector<8x128xf32>
    %209 = arith.mulf %208, %207 : vector<8x128xf32>
    %cst_107 = arith.constant 5.000000e-01 : f32
    %210 = vector.broadcast %cst_107 : f32 to vector<8x128xf32>
    %211 = arith.addf %209, %210 : vector<8x128xf32>
    %212 = vector.extract_strided_slice %203 {offsets = [0, 128], sizes = [8, 128], strides = [1, 1]} : vector<8x384xf32> to vector<8x128xf32>
    %213 = vector.extract_strided_slice %203 {offsets = [0, 256], sizes = [8, 128], strides = [1, 1]} : vector<8x384xf32> to vector<8x128xf32>
    %cst_108 = arith.constant 1.000000e+00 : f32
    %214 = vector.broadcast %cst_108 : f32 to vector<8x128xf32>
    %215 = arith.subf %214, %211 : vector<8x128xf32>
    %216 = arith.mulf %215, %196 : vector<8x128xf32>
    %217 = math.tanh %212 : vector<8x128xf32>
    %218 = arith.mulf %211, %217 : vector<8x128xf32>
    %219 = arith.addf %216, %218 : vector<8x128xf32>
    %220 = arith.index_cast %c4_i32 : i32 to index
    %c0_109 = arith.constant 0 : index
    %c0_110 = arith.constant 0 : index
    %221 = vector.load %arg3[%220, %c0_109, %c0_110] : memref<8x8x1xf32, #tpu.memory_space<vmem>>, vector<1x8x1xf32>
    %222 = vector.shape_cast %221 : vector<1x8x1xf32> to vector<8x1xf32>
    %223 = vector.shape_cast %222 : vector<8x1xf32> to vector<8x1xf32>
    %224 = vector.broadcast %223 : vector<8x1xf32> to vector<8x128xf32>
    %225 = arith.mulf %224, %219 : vector<8x128xf32>
    %226 = math.tanh %225 : vector<8x128xf32>
    %cst_111 = arith.constant 5.000000e-01 : f32
    %227 = vector.broadcast %cst_111 : f32 to vector<8x128xf32>
    %228 = arith.mulf %227, %213 : vector<8x128xf32>
    %229 = math.tanh %228 : vector<8x128xf32>
    %cst_112 = arith.constant 5.000000e-01 : f32
    %230 = vector.broadcast %cst_112 : f32 to vector<8x128xf32>
    %231 = arith.mulf %230, %229 : vector<8x128xf32>
    %cst_113 = arith.constant 5.000000e-01 : f32
    %232 = vector.broadcast %cst_113 : f32 to vector<8x128xf32>
    %233 = arith.addf %231, %232 : vector<8x128xf32>
    %234 = arith.mulf %226, %233 : vector<8x128xf32>
    %235 = arith.mulf %224, %234 : vector<8x128xf32>
    %c0_114 = arith.constant 0 : index
    %c0_115 = arith.constant 0 : index
    %236 = vector.load %arg8[%c0_114, %c0_115] : memref<8x128xf32, #tpu.memory_space<vmem>>, vector<8x128xf32>
    tpu.vector_store %arg8[%c0_114, %c0_115], %235 {strides = array<i32>} : memref<8x128xf32, #tpu.memory_space<vmem>>, vector<8x128xf32>,
    %c0_116 = arith.constant 0 : index
    %c0_117 = arith.constant 0 : index
    %237 = vector.load %arg9[%c0_116, %c0_117] : memref<8x128xf32, #tpu.memory_space<vmem>>, vector<8x128xf32>
    tpu.vector_store %arg9[%c0_116, %c0_117], %225 {strides = array<i32>} : memref<8x128xf32, #tpu.memory_space<vmem>>, vector<8x128xf32>,
    %238 = tpu.concatenate %235, %225 in 1 : vector<8x128xf32>, vector<8x128xf32> -> vector<8x256xf32>
    %239 = arith.index_cast %c4_i32 : i32 to index
    %c0_118 = arith.constant 0 : index
    %c0_119 = arith.constant 0 : index
    %240 = vector.load %arg7[%239, %c0_118, %c0_119] : memref<8x8x256xf32, #tpu.memory_space<vmem>>, vector<1x8x256xf32>
    %241 = vector.shape_cast %240 : vector<1x8x256xf32> to vector<8x256xf32>
    %242 = vector.shape_cast %238 : vector<8x256xf32> to vector<1x8x256xf32>
    tpu.vector_store %arg7[%239, %c0_118, %c0_119], %242 {strides = array<i32>} : memref<8x8x256xf32, #tpu.memory_space<vmem>>, vector<1x8x256xf32>,
    %c5_i32 = arith.constant 5 : i32
    %c0_120 = arith.constant 0 : index
    %c0_121 = arith.constant 0 : index
    %243 = vector.load %arg8[%c0_120, %c0_121] : memref<8x128xf32, #tpu.memory_space<vmem>>, vector<8x128xf32>
    %c0_122 = arith.constant 0 : index
    %c0_123 = arith.constant 0 : index
    %244 = vector.load %arg9[%c0_122, %c0_123] : memref<8x128xf32, #tpu.memory_space<vmem>>, vector<8x128xf32>
    %245 = arith.truncf %243 : vector<8x128xf32> to vector<8x128xbf16>
    %c0_124 = arith.constant 0 : index
    %c0_125 = arith.constant 0 : index
    %246 = vector.load %arg6[%c0_124, %c0_125] : memref<128x384xbf16, #tpu.memory_space<vmem>>, vector<128x384xbf16>
    %cst_126 = arith.constant dense<0.000000e+00> : vector<8x384xf32>
    %247 = tpu.matmul %245, %246, %cst_126 {dimension_numbers = #tpu.dot_dimension_numbers<[1], [0], [0], [1], [0, 0, 1, 1], [], []>} : vector<8x128xbf16>, vector<128x384xbf16>, vector<8x384xf32> -> vector<8x384xf32>
    %248 = arith.index_cast %c5_i32 : i32 to index
    %c0_127 = arith.constant 0 : index
    %c0_128 = arith.constant 0 : index
    %249 = vector.load %arg2[%248, %c0_127, %c0_128] : memref<8x8x384xf32, #tpu.memory_space<vmem>>, vector<1x8x384xf32>
    %250 = vector.shape_cast %249 : vector<1x8x384xf32> to vector<8x384xf32>
    %251 = arith.addf %247, %250 : vector<8x384xf32>
    %252 = vector.extract_strided_slice %251 {offsets = [0, 0], sizes = [8, 128], strides = [1, 1]} : vector<8x384xf32> to vector<8x128xf32>
    %cst_129 = arith.constant 5.000000e-01 : f32
    %253 = vector.broadcast %cst_129 : f32 to vector<8x128xf32>
    %254 = arith.mulf %253, %252 : vector<8x128xf32>
    %255 = math.tanh %254 : vector<8x128xf32>
    %cst_130 = arith.constant 5.000000e-01 : f32
    %256 = vector.broadcast %cst_130 : f32 to vector<8x128xf32>
    %257 = arith.mulf %256, %255 : vector<8x128xf32>
    %cst_131 = arith.constant 5.000000e-01 : f32
    %258 = vector.broadcast %cst_131 : f32 to vector<8x128xf32>
    %259 = arith.addf %257, %258 : vector<8x128xf32>
    %260 = vector.extract_strided_slice %251 {offsets = [0, 128], sizes = [8, 128], strides = [1, 1]} : vector<8x384xf32> to vector<8x128xf32>
    %261 = vector.extract_strided_slice %251 {offsets = [0, 256], sizes = [8, 128], strides = [1, 1]} : vector<8x384xf32> to vector<8x128xf32>
    %cst_132 = arith.constant 1.000000e+00 : f32
    %262 = vector.broadcast %cst_132 : f32 to vector<8x128xf32>
    %263 = arith.subf %262, %259 : vector<8x128xf32>
    %264 = arith.mulf %263, %244 : vector<8x128xf32>
    %265 = math.tanh %260 : vector<8x128xf32>
    %266 = arith.mulf %259, %265 : vector<8x128xf32>
    %267 = arith.addf %264, %266 : vector<8x128xf32>
    %268 = arith.index_cast %c5_i32 : i32 to index
    %c0_133 = arith.constant 0 : index
    %c0_134 = arith.constant 0 : index
    %269 = vector.load %arg3[%268, %c0_133, %c0_134] : memref<8x8x1xf32, #tpu.memory_space<vmem>>, vector<1x8x1xf32>
    %270 = vector.shape_cast %269 : vector<1x8x1xf32> to vector<8x1xf32>
    %271 = vector.shape_cast %270 : vector<8x1xf32> to vector<8x1xf32>
    %272 = vector.broadcast %271 : vector<8x1xf32> to vector<8x128xf32>
    %273 = arith.mulf %272, %267 : vector<8x128xf32>
    %274 = math.tanh %273 : vector<8x128xf32>
    %cst_135 = arith.constant 5.000000e-01 : f32
    %275 = vector.broadcast %cst_135 : f32 to vector<8x128xf32>
    %276 = arith.mulf %275, %261 : vector<8x128xf32>
    %277 = math.tanh %276 : vector<8x128xf32>
    %cst_136 = arith.constant 5.000000e-01 : f32
    %278 = vector.broadcast %cst_136 : f32 to vector<8x128xf32>
    %279 = arith.mulf %278, %277 : vector<8x128xf32>
    %cst_137 = arith.constant 5.000000e-01 : f32
    %280 = vector.broadcast %cst_137 : f32 to vector<8x128xf32>
    %281 = arith.addf %279, %280 : vector<8x128xf32>
    %282 = arith.mulf %274, %281 : vector<8x128xf32>
    %283 = arith.mulf %272, %282 : vector<8x128xf32>
    %c0_138 = arith.constant 0 : index
    %c0_139 = arith.constant 0 : index
    %284 = vector.load %arg8[%c0_138, %c0_139] : memref<8x128xf32, #tpu.memory_space<vmem>>, vector<8x128xf32>
    tpu.vector_store %arg8[%c0_138, %c0_139], %283 {strides = array<i32>} : memref<8x128xf32, #tpu.memory_space<vmem>>, vector<8x128xf32>,
    %c0_140 = arith.constant 0 : index
    %c0_141 = arith.constant 0 : index
    %285 = vector.load %arg9[%c0_140, %c0_141] : memref<8x128xf32, #tpu.memory_space<vmem>>, vector<8x128xf32>
    tpu.vector_store %arg9[%c0_140, %c0_141], %273 {strides = array<i32>} : memref<8x128xf32, #tpu.memory_space<vmem>>, vector<8x128xf32>,
    %286 = tpu.concatenate %283, %273 in 1 : vector<8x128xf32>, vector<8x128xf32> -> vector<8x256xf32>
    %287 = arith.index_cast %c5_i32 : i32 to index
    %c0_142 = arith.constant 0 : index
    %c0_143 = arith.constant 0 : index
    %288 = vector.load %arg7[%287, %c0_142, %c0_143] : memref<8x8x256xf32, #tpu.memory_space<vmem>>, vector<1x8x256xf32>
    %289 = vector.shape_cast %288 : vector<1x8x256xf32> to vector<8x256xf32>
    %290 = vector.shape_cast %286 : vector<8x256xf32> to vector<1x8x256xf32>
    tpu.vector_store %arg7[%287, %c0_142, %c0_143], %290 {strides = array<i32>} : memref<8x8x256xf32, #tpu.memory_space<vmem>>, vector<1x8x256xf32>,
    %c6_i32 = arith.constant 6 : i32
    %c0_144 = arith.constant 0 : index
    %c0_145 = arith.constant 0 : index
    %291 = vector.load %arg8[%c0_144, %c0_145] : memref<8x128xf32, #tpu.memory_space<vmem>>, vector<8x128xf32>
    %c0_146 = arith.constant 0 : index
    %c0_147 = arith.constant 0 : index
    %292 = vector.load %arg9[%c0_146, %c0_147] : memref<8x128xf32, #tpu.memory_space<vmem>>, vector<8x128xf32>
    %293 = arith.truncf %291 : vector<8x128xf32> to vector<8x128xbf16>
    %c0_148 = arith.constant 0 : index
    %c0_149 = arith.constant 0 : index
    %294 = vector.load %arg6[%c0_148, %c0_149] : memref<128x384xbf16, #tpu.memory_space<vmem>>, vector<128x384xbf16>
    %cst_150 = arith.constant dense<0.000000e+00> : vector<8x384xf32>
    %295 = tpu.matmul %293, %294, %cst_150 {dimension_numbers = #tpu.dot_dimension_numbers<[1], [0], [0], [1], [0, 0, 1, 1], [], []>} : vector<8x128xbf16>, vector<128x384xbf16>, vector<8x384xf32> -> vector<8x384xf32>
    %296 = arith.index_cast %c6_i32 : i32 to index
    %c0_151 = arith.constant 0 : index
    %c0_152 = arith.constant 0 : index
    %297 = vector.load %arg2[%296, %c0_151, %c0_152] : memref<8x8x384xf32, #tpu.memory_space<vmem>>, vector<1x8x384xf32>
    %298 = vector.shape_cast %297 : vector<1x8x384xf32> to vector<8x384xf32>
    %299 = arith.addf %295, %298 : vector<8x384xf32>
    %300 = vector.extract_strided_slice %299 {offsets = [0, 0], sizes = [8, 128], strides = [1, 1]} : vector<8x384xf32> to vector<8x128xf32>
    %cst_153 = arith.constant 5.000000e-01 : f32
    %301 = vector.broadcast %cst_153 : f32 to vector<8x128xf32>
    %302 = arith.mulf %301, %300 : vector<8x128xf32>
    %303 = math.tanh %302 : vector<8x128xf32>
    %cst_154 = arith.constant 5.000000e-01 : f32
    %304 = vector.broadcast %cst_154 : f32 to vector<8x128xf32>
    %305 = arith.mulf %304, %303 : vector<8x128xf32>
    %cst_155 = arith.constant 5.000000e-01 : f32
    %306 = vector.broadcast %cst_155 : f32 to vector<8x128xf32>
    %307 = arith.addf %305, %306 : vector<8x128xf32>
    %308 = vector.extract_strided_slice %299 {offsets = [0, 128], sizes = [8, 128], strides = [1, 1]} : vector<8x384xf32> to vector<8x128xf32>
    %309 = vector.extract_strided_slice %299 {offsets = [0, 256], sizes = [8, 128], strides = [1, 1]} : vector<8x384xf32> to vector<8x128xf32>
    %cst_156 = arith.constant 1.000000e+00 : f32
    %310 = vector.broadcast %cst_156 : f32 to vector<8x128xf32>
    %311 = arith.subf %310, %307 : vector<8x128xf32>
    %312 = arith.mulf %311, %292 : vector<8x128xf32>
    %313 = math.tanh %308 : vector<8x128xf32>
    %314 = arith.mulf %307, %313 : vector<8x128xf32>
    %315 = arith.addf %312, %314 : vector<8x128xf32>
    %316 = arith.index_cast %c6_i32 : i32 to index
    %c0_157 = arith.constant 0 : index
    %c0_158 = arith.constant 0 : index
    %317 = vector.load %arg3[%316, %c0_157, %c0_158] : memref<8x8x1xf32, #tpu.memory_space<vmem>>, vector<1x8x1xf32>
    %318 = vector.shape_cast %317 : vector<1x8x1xf32> to vector<8x1xf32>
    %319 = vector.shape_cast %318 : vector<8x1xf32> to vector<8x1xf32>
    %320 = vector.broadcast %319 : vector<8x1xf32> to vector<8x128xf32>
    %321 = arith.mulf %320, %315 : vector<8x128xf32>
    %322 = math.tanh %321 : vector<8x128xf32>
    %cst_159 = arith.constant 5.000000e-01 : f32
    %323 = vector.broadcast %cst_159 : f32 to vector<8x128xf32>
    %324 = arith.mulf %323, %309 : vector<8x128xf32>
    %325 = math.tanh %324 : vector<8x128xf32>
    %cst_160 = arith.constant 5.000000e-01 : f32
    %326 = vector.broadcast %cst_160 : f32 to vector<8x128xf32>
    %327 = arith.mulf %326, %325 : vector<8x128xf32>
    %cst_161 = arith.constant 5.000000e-01 : f32
    %328 = vector.broadcast %cst_161 : f32 to vector<8x128xf32>
    %329 = arith.addf %327, %328 : vector<8x128xf32>
    %330 = arith.mulf %322, %329 : vector<8x128xf32>
    %331 = arith.mulf %320, %330 : vector<8x128xf32>
    %c0_162 = arith.constant 0 : index
    %c0_163 = arith.constant 0 : index
    %332 = vector.load %arg8[%c0_162, %c0_163] : memref<8x128xf32, #tpu.memory_space<vmem>>, vector<8x128xf32>
    tpu.vector_store %arg8[%c0_162, %c0_163], %331 {strides = array<i32>} : memref<8x128xf32, #tpu.memory_space<vmem>>, vector<8x128xf32>,
    %c0_164 = arith.constant 0 : index
    %c0_165 = arith.constant 0 : index
    %333 = vector.load %arg9[%c0_164, %c0_165] : memref<8x128xf32, #tpu.memory_space<vmem>>, vector<8x128xf32>
    tpu.vector_store %arg9[%c0_164, %c0_165], %321 {strides = array<i32>} : memref<8x128xf32, #tpu.memory_space<vmem>>, vector<8x128xf32>,
    %334 = tpu.concatenate %331, %321 in 1 : vector<8x128xf32>, vector<8x128xf32> -> vector<8x256xf32>
    %335 = arith.index_cast %c6_i32 : i32 to index
    %c0_166 = arith.constant 0 : index
    %c0_167 = arith.constant 0 : index
    %336 = vector.load %arg7[%335, %c0_166, %c0_167] : memref<8x8x256xf32, #tpu.memory_space<vmem>>, vector<1x8x256xf32>
    %337 = vector.shape_cast %336 : vector<1x8x256xf32> to vector<8x256xf32>
    %338 = vector.shape_cast %334 : vector<8x256xf32> to vector<1x8x256xf32>
    tpu.vector_store %arg7[%335, %c0_166, %c0_167], %338 {strides = array<i32>} : memref<8x8x256xf32, #tpu.memory_space<vmem>>, vector<1x8x256xf32>,
    %c7_i32 = arith.constant 7 : i32
    %c0_168 = arith.constant 0 : index
    %c0_169 = arith.constant 0 : index
    %339 = vector.load %arg8[%c0_168, %c0_169] : memref<8x128xf32, #tpu.memory_space<vmem>>, vector<8x128xf32>
    %c0_170 = arith.constant 0 : index
    %c0_171 = arith.constant 0 : index
    %340 = vector.load %arg9[%c0_170, %c0_171] : memref<8x128xf32, #tpu.memory_space<vmem>>, vector<8x128xf32>
    %341 = arith.truncf %339 : vector<8x128xf32> to vector<8x128xbf16>
    %c0_172 = arith.constant 0 : index
    %c0_173 = arith.constant 0 : index
    %342 = vector.load %arg6[%c0_172, %c0_173] : memref<128x384xbf16, #tpu.memory_space<vmem>>, vector<128x384xbf16>
    %cst_174 = arith.constant dense<0.000000e+00> : vector<8x384xf32>
    %343 = tpu.matmul %341, %342, %cst_174 {dimension_numbers = #tpu.dot_dimension_numbers<[1], [0], [0], [1], [0, 0, 1, 1], [], []>} : vector<8x128xbf16>, vector<128x384xbf16>, vector<8x384xf32> -> vector<8x384xf32>
    %344 = arith.index_cast %c7_i32 : i32 to index
    %c0_175 = arith.constant 0 : index
    %c0_176 = arith.constant 0 : index
    %345 = vector.load %arg2[%344, %c0_175, %c0_176] : memref<8x8x384xf32, #tpu.memory_space<vmem>>, vector<1x8x384xf32>
    %346 = vector.shape_cast %345 : vector<1x8x384xf32> to vector<8x384xf32>
    %347 = arith.addf %343, %346 : vector<8x384xf32>
    %348 = vector.extract_strided_slice %347 {offsets = [0, 0], sizes = [8, 128], strides = [1, 1]} : vector<8x384xf32> to vector<8x128xf32>
    %cst_177 = arith.constant 5.000000e-01 : f32
    %349 = vector.broadcast %cst_177 : f32 to vector<8x128xf32>
    %350 = arith.mulf %349, %348 : vector<8x128xf32>
    %351 = math.tanh %350 : vector<8x128xf32>
    %cst_178 = arith.constant 5.000000e-01 : f32
    %352 = vector.broadcast %cst_178 : f32 to vector<8x128xf32>
    %353 = arith.mulf %352, %351 : vector<8x128xf32>
    %cst_179 = arith.constant 5.000000e-01 : f32
    %354 = vector.broadcast %cst_179 : f32 to vector<8x128xf32>
    %355 = arith.addf %353, %354 : vector<8x128xf32>
    %356 = vector.extract_strided_slice %347 {offsets = [0, 128], sizes = [8, 128], strides = [1, 1]} : vector<8x384xf32> to vector<8x128xf32>
    %357 = vector.extract_strided_slice %347 {offsets = [0, 256], sizes = [8, 128], strides = [1, 1]} : vector<8x384xf32> to vector<8x128xf32>
    %cst_180 = arith.constant 1.000000e+00 : f32
    %358 = vector.broadcast %cst_180 : f32 to vector<8x128xf32>
    %359 = arith.subf %358, %355 : vector<8x128xf32>
    %360 = arith.mulf %359, %340 : vector<8x128xf32>
    %361 = math.tanh %356 : vector<8x128xf32>
    %362 = arith.mulf %355, %361 : vector<8x128xf32>
    %363 = arith.addf %360, %362 : vector<8x128xf32>
    %364 = arith.index_cast %c7_i32 : i32 to index
    %c0_181 = arith.constant 0 : index
    %c0_182 = arith.constant 0 : index
    %365 = vector.load %arg3[%364, %c0_181, %c0_182] : memref<8x8x1xf32, #tpu.memory_space<vmem>>, vector<1x8x1xf32>
    %366 = vector.shape_cast %365 : vector<1x8x1xf32> to vector<8x1xf32>
    %367 = vector.shape_cast %366 : vector<8x1xf32> to vector<8x1xf32>
    %368 = vector.broadcast %367 : vector<8x1xf32> to vector<8x128xf32>
    %369 = arith.mulf %368, %363 : vector<8x128xf32>
    %370 = math.tanh %369 : vector<8x128xf32>
    %cst_183 = arith.constant 5.000000e-01 : f32
    %371 = vector.broadcast %cst_183 : f32 to vector<8x128xf32>
    %372 = arith.mulf %371, %357 : vector<8x128xf32>
    %373 = math.tanh %372 : vector<8x128xf32>
    %cst_184 = arith.constant 5.000000e-01 : f32
    %374 = vector.broadcast %cst_184 : f32 to vector<8x128xf32>
    %375 = arith.mulf %374, %373 : vector<8x128xf32>
    %cst_185 = arith.constant 5.000000e-01 : f32
    %376 = vector.broadcast %cst_185 : f32 to vector<8x128xf32>
    %377 = arith.addf %375, %376 : vector<8x128xf32>
    %378 = arith.mulf %370, %377 : vector<8x128xf32>
    %379 = arith.mulf %368, %378 : vector<8x128xf32>
    %c0_186 = arith.constant 0 : index
    %c0_187 = arith.constant 0 : index
    %380 = vector.load %arg8[%c0_186, %c0_187] : memref<8x128xf32, #tpu.memory_space<vmem>>, vector<8x128xf32>
    tpu.vector_store %arg8[%c0_186, %c0_187], %379 {strides = array<i32>} : memref<8x128xf32, #tpu.memory_space<vmem>>, vector<8x128xf32>,
    %c0_188 = arith.constant 0 : index
    %c0_189 = arith.constant 0 : index
    %381 = vector.load %arg9[%c0_188, %c0_189] : memref<8x128xf32, #tpu.memory_space<vmem>>, vector<8x128xf32>
    tpu.vector_store %arg9[%c0_188, %c0_189], %369 {strides = array<i32>} : memref<8x128xf32, #tpu.memory_space<vmem>>, vector<8x128xf32>,
    %382 = tpu.concatenate %379, %369 in 1 : vector<8x128xf32>, vector<8x128xf32> -> vector<8x256xf32>
    %383 = arith.index_cast %c7_i32 : i32 to index
    %c0_190 = arith.constant 0 : index
    %c0_191 = arith.constant 0 : index
    %384 = vector.load %arg7[%383, %c0_190, %c0_191] : memref<8x8x256xf32, #tpu.memory_space<vmem>>, vector<1x8x256xf32>
    %385 = vector.shape_cast %384 : vector<1x8x256xf32> to vector<8x256xf32>
    %386 = vector.shape_cast %382 : vector<8x256xf32> to vector<1x8x256xf32>
    tpu.vector_store %arg7[%383, %c0_190, %c0_191], %386 {strides = array<i32>} : memref<8x8x256xf32, #tpu.memory_space<vmem>>, vector<1x8x256xf32>,
    %c8_i32 = arith.constant 8 : i32
    return
  }
  func.func @transform_0(%arg0: i32, %arg1: i32) -> (i32, i32, i32) {
    %c0_i32 = arith.constant 0 : i32
    %c0_i32_0 = arith.constant 0 : i32
    return %arg1, %arg0, %c0_i32 : i32, i32, i32
  }
  func.func @transform_1(%arg0: i32, %arg1: i32) -> (i32, i32, i32) {
    %c0_i32 = arith.constant 0 : i32
    %c0_i32_0 = arith.constant 0 : i32
    return %arg1, %arg0, %c0_i32 : i32, i32, i32
  }
  func.func @transform_2(%arg0: i32, %arg1: i32) -> (i32, i32) {
    %c0_i32 = arith.constant 0 : i32
    %c0_i32_0 = arith.constant 0 : i32
    return %arg0, %c0_i32 : i32, i32
  }
  func.func @transform_3(%arg0: i32, %arg1: i32) -> (i32, i32) {
    %c0_i32 = arith.constant 0 : i32
    %c0_i32_0 = arith.constant 0 : i32
    return %arg0, %c0_i32 : i32, i32
  }
  func.func @transform_4(%arg0: i32, %arg1: i32) -> (i32, i32) {
    %c0_i32 = arith.constant 0 : i32
    %c0_i32_0 = arith.constant 0 : i32
    %c0_i32_1 = arith.constant 0 : i32
    return %c0_i32, %c0_i32_0 : i32, i32
  }
  func.func @transform_5(%arg0: i32, %arg1: i32) -> (i32, i32, i32) {
    %c0_i32 = arith.constant 0 : i32
    %c0_i32_0 = arith.constant 0 : i32
    return %arg1, %arg0, %c0_i32 : i32, i32, i32
  }
}

</mosaic_0001>

<bundles_post_ra>
// kernel: tpu_custom_call.1
= control target key start
LH: loop header
LB: loop body
LE: loop exit
PB: predicated region body
PF: predicated region fallthrough
CT: control target
= control target key end

     0   :  { %10 = vsyncpa [#allocation5], 0  ;;  %s4260_s0 = inlined_call_operand.hbm [shape: f32[16,8,384], index: 0, kind: input, shape index: {}]   ;;  %s4261_s1 = inlined_call_operand.vmem [shape: f32[16,8,1], index: 1, kind: input, shape index: {}]   ;;  %s4262_s2 = inlined_call_operand.vmem [shape: f32[8,128], index: 2, kind: input, shape index: {}]   ;;  %s4263_s3 = inlined_call_operand.vmem [shape: f32[8,128], index: 3, kind: input, shape index: {}]   ;;  %s4264_s4 = inlined_call_operand.hbm [shape: bf16[128,384], index: 4, kind: input, shape index: {}]   ;;  %s4265_s5 = inlined_call_operand.hbm [shape: f32[16,8,256], index: 5, kind: output, shape index: {}]  }
   0x1   :  { %12 = vsyncpa [#allocation5 + $0x1], 0 }
   0x2   :  { %13 = vsyncpa [#allocation8], 0 }
   0x3   :  { %14 = vsyncpa [#allocation6], 0 }
   0x4   :  { %16 = vsyncpa [#allocation6 + $0x1], 0  ;;  %s3668_s18 = smov 0   ;;  %s3670_s19 = smov 0  }
   0x5   :  { %s3672_s20 = smov 0   ;;  %s3674_s21 = smov 0  }
   0x6   :  { %s3676_s22 = smov 0   ;;  %s3678_s23 = smov 0  }
   0x7 LB: > { %s2727_s24 = sadd.s32 4294967295, %s3624_s23   ;;  %s2728_s25 = sadd.s32 4294967294, %s3624_s23   ;;  %s3624_s23 = sphi %s3678_s23, %s22_s23   ;;  %s3620_s22 = sphi %s3676_s22, %s4288_s22   ;;  %s3616_s21 = sphi %s3674_s21, %s4287_s21   ;;  %s3612_s20 = sphi %s3672_s20, %s4286_s20   ;;  %s3608_s19 = sphi %s3670_s19, %s4285_s19   ;;  %s3604_s18 = sphi %s3668_s18, %s4284_s18  }
   0x8   : > { %p56_p0 = scmp.ne.s32.totalorder %s3608_s19, %s3604_s18  ;;  %p3702_p1 = scmp.eq.s32.totalorder %s2727_s24, 0 }
   0x9   : > { %p3706_p2 = scmp.eq.s32.totalorder %s2727_s24, 1  ;;  %p189_p3 = scmp.eq.s32.totalorder %s2728_s25, 1 }
   0xa   : > { %s4270_s26 = scalar_select %p3702_p1, 1, 0 }
   0xb   : > { %s4271_s27 = scalar_select %p3706_p2, 1, 0 }
   0xc   : > { %p3712_p4 = por %p3702_p1, %p56_p0  ;;  %p2729_p5 = scmp.ge.s32.totalorder %s3624_s23, 1 }
   0xd   : > { %p3717_p6 = por %p189_p3, %p56_p0  ;;  %p196_p7 = scmp.lt.s32.totalorder %s3624_s23, 3 }
   0xe   : > { %s4272_s28 = scalar_select %p3712_p4, 1, 0 }
   0xf   : > { %s4273_s29 = scalar_select %p3717_p6, 1, 0 }
  0x10   : > { %p3722_p8 = pnand %p2729_p5, %p196_p7  ;;  %s3626_s6 = smov [#allocation7]  }
  0x11   : > { %s222_s7 = sshll.u32 %s3626_s6, 4  ;;  %s31_s9 = sadd.s32 1, %s3620_s22  ;;  %s223_s7 = int_to_ptr.vmem [resolvable:$true] %s222_s7 }
  0x12   : > { %s4274_s30 = scalar_select %p3722_p8, 1, 0 }
  0x13   : > { %p3228_p9 = pneg %p3722_p8  ;;  %s3480_s12 = scalar_lea.hbm %s4264_s4, 3072 }
  0x14   : > { %p3481_p12 = scmp.ne.s32.totalorder %s4264_s4, %s3480_s12  ;;  %p3487_p5 = scmp.lt.u32.totalorder %s3480_s12, %s4264_s4 }
  0x15   : > { %p3731_p11 = pnand %p3228_p9, %p3702_p1 }
  0x17   : > { %p3482_p13 = pneg %p3731_p11 }
  0x19   : > { %p3483_p0 = pnand %p3482_p13, %p3481_p12 }
  0x1b   : > { %p3484_p3 = pneg %p3483_p0 }
  0x1d   : > { %p3489_p7 = pnand %p3487_p5, %p3484_p3 }
  0x1f   : > { %3492 = shalt.err (!%p3489_p7)
}
  0x20   : > { %s3493_s17 = scalar_lea.vmem %s223_s7, 3072  ;;  %p3501_p1 = scmp.lt.s32.totalorder %s223_s7, %s223_s7 }
  0x21   : > { %p3494_p9 = scmp.ne.s32.totalorder %s223_s7, %s3493_s17  ;;  %p3502_p4 = scmp.lt.s32.totalorder %s3493_s17, %s3493_s17 }
  0x23   : > { %p3496_p10 = pnand %p3494_p9, %p3482_p13  ;;  %p3503_p8 = por %p3502_p4, %p3501_p1 }
  0x25   : > { %p3497_p6 = pneg %p3496_p10 }
  0x27   : > { %p3504_p2 = pnand %p3503_p8, %p3497_p6 }
  0x29   : > { %3507 = shalt.err (!%p3504_p2)
}
  0x2a   : > { %s3627_s24 = smov 192   ;;  %s3628_s25 = smov 12  }
  0x2b   : > { %3231 = dma.hbm_to_vmem [thread:$0]  (!%p3731_p11), %s4264_s4, 3072, %s223_s7, [#allocation8], %s3627_s24, %s3627_s24, %s3628_s25  }
  0x2c   : > { %p32_p1 = scmp.ge.s32.totalorder %s31_s9, 2  ;;  %s43_s11 = sadd.s32 1, %s3612_s20 }
  0x2d   : > { %p50_p2 = scmp.ne.s32.totalorder %s3612_s20, %s3608_s19  ;;  %p51_p4 = scmp.eq.s32.totalorder %s3624_s23, 0 }
  0x2e   : > { %s4290_s9 = smov (%p32_p1, %s31_s9), 0  ;;  %p4276_p8 = scmp.ne.s32.totalorder %s4271_s27, 0 }
  0x2f   : > { %p52_p6 = por %p51_p4, %p50_p2  ;;  %s38_s13 = ssub.s32 %s3620_s22, %s4290_s9 }
  0x30   : > { %p3760_p10 = por %p4276_p8, %p50_p2  ;;  %p3241_p12 = scmp.lt.s32.totalorder %s3624_s23, 2 }
  0x31   : > { %p41_p13 = scmp.eq.s32.totalorder %s38_s13, 0  ;;  %s236_s8 = sand.u32 1, %s3612_s20  }
  0x32   : > { %s3217_s14 = smul.u32 192, %s236_s8  ;;  %p3772_p11 = pnand %p3241_p12, %p52_p6 }
  0x33   : > { %s3769_s15 = scalar_select %p41_p13, %s3612_s20, %s43_s11  }
  0x34   : > { %s3218_s7 = smul.u32 3072, %s3620_s22  ;;  %s240_s16 = scalar_lea.vmem [#allocation4], %s3217_s14 }
  0x35   : > { %s250_s17 = sshll.u32 %s240_s16, 4  ;;  %s3783_s10 = scalar_lea.sflag [#allocation5], %s236_s8  ;;  %s3781_s17 = int_to_ptr.vmem [resolvable:$true] %s250_s17 }
  0x36   : > { %s3779_s6 = scalar_lea.hbm %s4260_s0, %s3218_s7  ;;  %p3510_p3 = pneg %p3772_p11 }
  0x37   : > { %s3508_s11 = scalar_lea.hbm %s3779_s6, 3072  ;;  %s3513_s7 = scalar_lea.hbm %s4260_s0, 6144 }
  0x38   : > { %p3509_p0 = scmp.ne.s32.totalorder %s3779_s6, %s3508_s11  ;;  %p3514_p9 = scmp.lt.u32.totalorder %s3779_s6, %s4260_s0 }
  0x39   : > { %p3515_p1 = scmp.lt.u32.totalorder %s3513_s7, %s3508_s11  ;;  %p3517_p4 = scmp.lt.u32.totalorder %s3508_s11, %s3779_s6 }
  0x3a   : > { %p3511_p5 = pnand %p3510_p3, %p3509_p0 }
  0x3b   : > { %p3516_p2 = por %p3515_p1, %p3514_p9 }
  0x3c   : > { %p3512_p7 = pneg %p3511_p5 }
  0x3d   : > { %p3518_p6 = por %p3517_p4, %p3516_p2 }
  0x3f   : > { %p3519_p8 = pnand %p3518_p6, %p3512_p7 }
  0x41   : > { %3522 = shalt.err (!%p3519_p8)
}
  0x42   : > { %s3523_s8 = scalar_lea.vmem %s3781_s17, 3072  ;;  %s3629_s27 = smov [#allocation4]  }
  0x43   : > { %p3524_p12 = scmp.ne.s32.totalorder %s3781_s17, %s3523_s8  ;;  %s3528_s13 = sshll.u32 %s3629_s27, 4  ;;  %s3529_s13 = int_to_ptr.vmem [resolvable:$false] %s3528_s13 }
  0x44   : > { %s3530_s14 = scalar_lea.vmem %s3529_s13, 6144  ;;  %p3531_p5 = scmp.lt.s32.totalorder %s3781_s17, %s3529_s13 }
  0x45   : > { %p3526_p13 = pnand %p3524_p12, %p3510_p3  ;;  %p3532_p9 = scmp.lt.s32.totalorder %s3530_s14, %s3523_s8 }
  0x47   : > { %p3527_p0 = pneg %p3526_p13  ;;  %p3533_p1 = por %p3532_p9, %p3531_p5 }
  0x49   : > { %p3534_p2 = pnand %p3533_p1, %p3527_p0 }
  0x4b   : > { %3537 = shalt.err (!%p3534_p2)
}
  0x4c   : > { %s3630_s11 = smov 384   ;;  %s3631_s7 = smov 24  }
  0x4d   : > { %3235 = dma.hbm_to_vmem [thread:$0]  (!%p3772_p11), %s3779_s6, 3072, %s3781_s17, %s3783_s10, %s3630_s11, %s3630_s11, %s3631_s7  }
  0x4e   : > { %p4279_p3 = scmp.ne.s32.totalorder %s4274_s30, 0 }
  0x4f   : > { %s3814_s16 = sand.u32 (!%p4279_p3), 1, %s3608_s19   ;;  %p4280_p7 = scmp.ne.s32.totalorder (!%p4279_p3), %s4272_s28, 0 }
  0x50   : > { %274 = sbr.rel (%p4279_p3) target bundleno = 2197 (0x895), region = 40  ;;  %s277_s8 = scalar_lea.sflag (!%p4279_p3), [#allocation5], %s3814_s16 }
  0x51   : > { %s3219_s25 = smul.u32 (!%p4279_p3), 192, %s3814_s16 }
  0x53   : > { %s3818_s27 = scalar_lea.vmem (!%p4279_p3), [#allocation4], %s3219_s25 }
  0x57   : > { %3591 = dma.done.wait (%p4280_p7), %s277_s8, 3072  }
  0x58   : > { %3593 = vsyncadd (%p4280_p7), %s277_s8, 4294964224  ;;  %p4281_p11 = scmp.ne.s32.totalorder %s4270_s26, 0 }
  0x5a   : > { %3595 = dma.done.wait (%p4281_p11), [#allocation8], 3072  }
  0x5b   : > { %3597 = vsyncadd (%p4281_p11), [#allocation8], 4294964224  ;;  %s2739_s30 = sshll.u32 %s3814_s16, 7  ;;  %s2740_s17 = sshll.u32 %s3616_s21, 3 }
  0x5c   : > { %p329_p4 = scmp.lt.s32.totalorder %s2740_s17, 15  ;;  %s3835_s28 = scalar_lea.vmem [#allocation9], %s2739_s30 }
  0x5d   : > { %p2742_p6 = scmp.ne.s32.totalorder %s3616_s21, 0 }
  0x5e   : > { %s4292_s17 = smov (!%p329_p4, %s2740_s17), 15  ;;  %v351_v0 = vld [vmem:[%s4262_s2] sm:$0xff] (!%p2742_p6) }
  0x5f   : > { %s2741_s24 = sshll.u32 %s4292_s17, 3  ;;  %350 = sbr.rel (%p2742_p6) target bundleno = 102 (0x66), region = 52  ;;  %v353_v1 = vld [vmem:[%s4263_s3] sm:$0xff] (!%p2742_p6)  ;;  %352 = vst [vmem:[#allocation2] sm:$0xff] (!%p2742_p6), %v351_v0 }
  0x60   : > { %s3833_s13 = scalar_lea.vmem %s4261_s1, %s2741_s24  ;;  %354 = vst [vmem:[#allocation3] sm:$0xff] (!%p2742_p6), %v353_v1 }
  0x66 PF: > { %v3844_v2 = vld [vmem:[#allocation7 + $0x4] ss:$12 sps:$4 sm:$0xff]   ;;  %v3846_v3 = vld [vmem:[#allocation7] ss:$12 sps:$4 sm:$0xff]   ;;  %v3632_v4 = vmov 0.0   ;;  %v3633_v5 = vmov 0  }
  0x67   : > { %3057 = vmatprep.subr.bf16.mxu1 %v3632_v4  ;;  %553 = vmatprep.mubr.bf16.mxu0 %v3633_v5  ;;  %v3851_v6 = vld [vmem:[#allocation7 + $0x1c] ss:$12 sps:$4 sm:$0xff]   ;;  %vm3634_vm0 = vmmov 0   ;;  %v3856_v7 = vld [vmem:[#allocation7 + $0x18] ss:$12 sps:$4 sm:$0xff]   ;;  %v611_v21 = vld [vmem:[%s3833_s13] sm:$0xff] }
  0x68   : > { %521 = vmatprep.subr.bf16.mxu0 %v3844_v2  ;;  %3073 = vmatprep.mubr.msk.bf16.mxu1 %vm3634_vm0, %v3632_v4  ;;  %v3860_v8 = vld [vmem:[#allocation7 + $0x34] ss:$12 sps:$4 sm:$0xff]   ;;  %v3863_v9 = vld [vmem:[#allocation7 + $0x30] ss:$12 sps:$4 sm:$0xff]   ;;  %v3867_v11 = vld [vmem:[#allocation7 + $0x4c] ss:$12 sps:$4 sm:$0xff]  }
  0x69   : > { %522 = vmatpush1.bf16.msra.mxu0 %v3846_v3  ;;  %3302 = vset.pattern.permute.xlu0 %v3633_v5  ;;  %v3319_v10 = vld [vmem:[#allocation7 + $0x8] ss:$12 sps:$4 sm:$0xff]   ;;  %v3323_v12 = vld [vmem:[#allocation7 + $0x20] ss:$12 sps:$4 sm:$0xff]   ;;  %v3874_v14 = vld [vmem:[#allocation7 + $0x64] ss:$12 sps:$4 sm:$0xff]  }
  0x6a   : > { %523 = vmatprep.subr.bf16.mxu0 %v3851_v6  ;;  %3303 = vset.pattern.permute.xlu1 %v3633_v5  ;;  %v3871_v13 = vld [vmem:[#allocation7 + $0x48] ss:$12 sps:$4 sm:$0xff]   ;;  %v3327_v15 = vld [vmem:[#allocation7 + $0x38] ss:$12 sps:$4 sm:$0xff]   ;;  %v3878_v16 = vld [vmem:[#allocation7 + $0x60] ss:$12 sps:$4 sm:$0xff]  }
  0x6b   : > { %3058 = vmatpush3.bf16.msra.mxu1 %v3319_v10  ;;  %v3881_v17 = vld [vmem:[#allocation7 + $0x7c] ss:$12 sps:$4 sm:$0xff]   ;;  %v3885_v19 = vld [vmem:[#allocation7 + $0x78] ss:$12 sps:$4 sm:$0xff]   ;;  %v3887_v20 = vld [vmem:[#allocation7 + $0x94] ss:$12 sps:$4 sm:$0xff]   ;;  %614 = vperm.xlu0 %3302, %v611_v21  }
  0x6c   : > { %3059 = vmatprep.subr.bf16.mxu1 %v3632_v4  ;;  %v3331_v18 = vld [vmem:[#allocation7 + $0x50] ss:$12 sps:$4 sm:$0xff]   ;;  %v3332_v22 = vld [vmem:[#allocation7 + $0x68] ss:$12 sps:$4 sm:$0xff]   ;;  %v3894_v25 = vld [vmem:[#allocation7 + $0xac] ss:$12 sps:$4 sm:$0xff]  }
  0x6d   : > { %524 = vmatpush1.bf16.msra.mxu0 %v3856_v7  ;;  %v2794_v23 = vld [vmem:[%s3833_s13 + $0x8] sm:$0xff]  ;;  %v3333_v26 = vld [vmem:[#allocation7 + $0x80] ss:$12 sps:$4 sm:$0xff]   ;;  %v2884_v27 = vld [vmem:[%s3833_s13 + $0x20] sm:$0xff]  ;;  %s2984_s25 = sshll.u32 %s3616_s21, 11  ;;  %s2585_s8 = sshll.u32 %s3835_s28, 4  ;;  %s4210_s8 = int_to_ptr.vmem [resolvable:$true] %s2585_s8 }
  0x6e   : > { %525 = vmatprep.subr.bf16.mxu0 %v3860_v8  ;;  %v3892_v24 = vld [vmem:[#allocation7 + $0x90] ss:$12 sps:$4 sm:$0xff]   ;;  %v3900_v28 = vld [vmem:[#allocation7 + $0xa8] ss:$12 sps:$4 sm:$0xff]   ;;  %v3334_v30 = vld [vmem:[#allocation7 + $0x98] ss:$12 sps:$4 sm:$0xff]   ;;  %s4208_s17 = scalar_lea.hbm %s4265_s5, %s2984_s25 }
  0x6f   : > { %3060 = vmatpush3.bf16.msra.mxu1 %v3323_v12  ;;  %890 = vperm.xlu0 %3302, %v2794_v23   ;;  %v355_v29 = vld [vmem:[#allocation2] sm:$0xff]  ;;  %v2944_v31 = vld [vmem:[%s3833_s13 + $0x30] sm:$0xff]  ;;  %v391_v46 = vld [vmem:[%s3818_s27 + $0x8] sm:$0xff]  ;;  %s2569_s24 = scalar_lea.sflag [#allocation6], %s3814_s16  ;;  %s3538_s6 = scalar_lea.vmem %s4210_s8, 2048 }
  0x70   : > { %3061 = vmatprep.subr.bf16.mxu1 %v3632_v4  ;;  %v357_v32 = vpack.c.bf16 %v355_v29, %v355_v29  ;;  %v3335_v33 = vld [vmem:[#allocation7 + $0xb0] ss:$12 sps:$4 sm:$0xff]   ;;  %v3336_v34 = vld [vmem:[#allocation7 + $0x8] ss:$12 sps:$4 sm:$0xff]   ;;  %v3337_v35 = vld [vmem:[#allocation7 + $0x20] ss:$12 sps:$4 sm:$0xff]   ;;  %p3539_p8 = scmp.ne.s32.totalorder %s4210_s8, %s3538_s6 }
  0x71   : > { %526 = vmatpush1.bf16.msra.mxu0 %v3863_v9  ;;  %v3338_v36 = vld [vmem:[#allocation7 + $0x38] ss:$12 sps:$4 sm:$0xff]   ;;  %v3339_v37 = vld [vmem:[#allocation7 + $0x50] ss:$12 sps:$4 sm:$0xff]   ;;  %v3340_v38 = vld [vmem:[#allocation7 + $0x68] ss:$12 sps:$4 sm:$0xff]  }
  0x72   : > { %527 = vmatprep.subr.bf16.mxu0 %v3867_v11  ;;  %v3341_v39 = vld [vmem:[#allocation7 + $0x80] ss:$12 sps:$4 sm:$0xff]   ;;  %v3342_v40 = vld [vmem:[#allocation7 + $0x98] ss:$12 sps:$4 sm:$0xff]   ;;  %v3343_v41 = vld [vmem:[#allocation7 + $0xb0] ss:$12 sps:$4 sm:$0xff]   ;;  %p3540_p12 = pnand %p3539_p8, %p3760_p10 }
  0x73   : > { %3062 = vmatpush3.bf16.msra.mxu1 %v3327_v15  ;;  %1721 = vperm.xlu0 %3302, %v2884_v27   ;;  %v390_v42 = vld [vmem:[%s3818_s27] sm:$0xff]  ;;  %v392_v52 = vld [vmem:[%s3818_s27 + $0x10] sm:$0xff]  ;;  %v356_v62 = vld [vmem:[#allocation3] sm:$0xff]  ;;  %s3635_s21 = smov [#allocation9]  }
  0x74   : > { %3063 = vmatprep.subr.bf16.mxu1 %v3632_v4  ;;  %p3541_p13 = pneg %p3540_p12  ;;  %s3542_s10 = sshll.u32 %s3635_s21, 4  ;;  %s3543_s10 = int_to_ptr.vmem [resolvable:$false] %s3542_s10 }
  0x75   : > { %528 = vmatpush1.bf16.msra.mxu0 %v3871_v13  ;;  %p3545_p0 = scmp.lt.s32.totalorder %s4210_s8, %s3543_s10 }
  0x76   : > { %529 = vmatprep.subr.bf16.mxu0 %v3874_v14 }
  0x77   : > { %3064 = vmatpush3.bf16.msra.mxu1 %v3331_v18  ;;  %2275 = vperm.xlu0 %3302, %v2944_v31   ;;  %v3345_v31 = vld [vmem:[#allocation7 + $0x20] ss:$12 sps:$4 sm:$0xff]  }
  0x78   : > { %3065 = vmatprep.subr.bf16.mxu1 %v3632_v4 }
  0x79   : > { %530 = vmatpush1.bf16.msra.mxu0 %v3878_v16 }
  0x7a   : > { %531 = vmatprep.subr.bf16.mxu0 %v3881_v17 }
  0x7b   : > { %3066 = vmatpush3.bf16.msra.mxu1 %v3332_v22 }
  0x7c   : > { %3067 = vmatprep.subr.bf16.mxu1 %v3632_v4 }
  0x7d   : > { %532 = vmatpush1.bf16.msra.mxu0 %v3885_v19 }
  0x7e   : > { %533 = vmatprep.subr.bf16.mxu0 %v3887_v20 }
  0x7f   : > { %3068 = vmatpush3.bf16.msra.mxu1 %v3333_v26 }
  0x80   : > { %3069 = vmatprep.subr.bf16.mxu1 %v3632_v4 }
  0x81   : > { %534 = vmatpush1.bf16.msra.mxu0 %v3892_v24 }
  0x82   : > { %535 = vmatprep.subr.bf16.mxu0 %v3894_v25 }
  0x83   : > { %3070 = vmatpush3.bf16.msra.mxu1 %v3334_v30  ;;  %v3344_v30 = vld [vmem:[#allocation7 + $0x8] ss:$12 sps:$4 sm:$0xff]  }
  0x84   : > { %3071 = vmatprep.subr.bf16.mxu1 %v3632_v4 }
  0x85   : > { %536 = vmatpush1.bf16.msra.mxu0 %v3900_v28 }
  0x86   : > { %796 = vmatprep.subr.bf16.mxu0 %v3844_v2 }
  0x87   : > { %3072 = vmatpush3.bf16.msra.mxu1 %v3335_v33  ;;  %v3347_v33 = vld [vmem:[#allocation7 + $0x50] ss:$12 sps:$4 sm:$0xff]  }
  0x88   : > { %554 = vmatmul.mubr.bf16.vlgmr.msra.gmra.mrb[0].mxu0 %v357_v32  ;;  %3077 = vmatprep.subr.bf16.mxu1 %v3632_v4 }
  0x89   : > { %797 = vmatpush1.bf16.msra.mxu0 %v3846_v3  ;;  %828 = vmatprep.mubr.bf16.mxu0 %v3633_v5 }
  0x8a   : > { %798 = vmatprep.subr.bf16.mxu0 %v3851_v6  ;;  %3074 = vmatmul.mubr.bf16.vlgmr.msra.gmra.mrb[0].mxu1 %v357_v32  ;;  %v3346_v32 = vld [vmem:[#allocation7 + $0x38] ss:$12 sps:$4 sm:$0xff]  }
  0x8b   : > { %3093 = vmatprep.mubr.msk.bf16.mxu1 %vm3634_vm0, %v3632_v4  ;;  %3078 = vmatpush3.bf16.msra.mxu1 %v3336_v34  ;;  %v3348_v34 = vld [vmem:[#allocation7 + $0x68] ss:$12 sps:$4 sm:$0xff]  }
  0x8c   : > { %3079 = vmatprep.subr.bf16.mxu1 %v3632_v4 }
  0x8d   : > { %799 = vmatpush1.bf16.msra.mxu0 %v3856_v7 }
  0x8e   : > { %800 = vmatprep.subr.bf16.mxu0 %v3860_v8 }
  0x8f   : > { %3080 = vmatpush3.bf16.msra.mxu1 %v3337_v35  ;;  %v3350_v35 = vld [vmem:[#allocation7 + $0x98] ss:$12 sps:$4 sm:$0xff]  }
  0x90   : > { %3081 = vmatprep.subr.bf16.mxu1 %v3632_v4 }
  0x91   : > { %801 = vmatpush1.bf16.msra.mxu0 %v3863_v9 }
  0x92   : > { %802 = vmatprep.subr.bf16.mxu0 %v3867_v11 }
  0x93   : > { %3082 = vmatpush3.bf16.msra.mxu1 %v3338_v36  ;;  %v3351_v36 = vld [vmem:[#allocation7 + $0xb0] ss:$12 sps:$4 sm:$0xff]  }
  0x94   : > { %3083 = vmatprep.subr.bf16.mxu1 %v3632_v4 }
  0x95   : > { %803 = vmatpush1.bf16.msra.mxu0 %v3871_v13 }
  0x96   : > { %804 = vmatprep.subr.bf16.mxu0 %v3874_v14 }
  0x97   : > { %3084 = vmatpush3.bf16.msra.mxu1 %v3339_v37  ;;  %v2824_v37 = vld [vmem:[%s3833_s13 + $0x10] sm:$0xff] }
  0x98   : > { %3085 = vmatprep.subr.bf16.mxu1 %v3632_v4  ;;  %1167 = vperm.xlu1 %3303, %v2824_v37  }
  0x99   : > { %805 = vmatpush1.bf16.msra.mxu0 %v3878_v16 }
  0x9a   : > { %806 = vmatprep.subr.bf16.mxu0 %v3881_v17 }
  0x9b   : > { %3086 = vmatpush3.bf16.msra.mxu1 %v3340_v38  ;;  %v2854_v38 = vld [vmem:[%s3833_s13 + $0x18] sm:$0xff] }
  0x9c   : > { %3087 = vmatprep.subr.bf16.mxu1 %v3632_v4  ;;  %1444 = vperm.xlu1 %3303, %v2854_v38  }
  0x9d   : > { %807 = vmatpush1.bf16.msra.mxu0 %v3885_v19 }
  0x9e   : > { %808 = vmatprep.subr.bf16.mxu0 %v3887_v20 }
  0x9f   : > { %3088 = vmatpush3.bf16.msra.mxu1 %v3341_v39  ;;  %v2914_v39 = vld [vmem:[%s3833_s13 + $0x28] sm:$0xff] }
  0xa0   : > { %3089 = vmatprep.subr.bf16.mxu1 %v3632_v4  ;;  %1998 = vperm.xlu1 %3303, %v2914_v39  }
  0xa1   : > { %809 = vmatpush1.bf16.msra.mxu0 %v3892_v24 }
  0xa2   : > { %810 = vmatprep.subr.bf16.mxu0 %v3894_v25 }
  0xa3   : > { %3090 = vmatpush3.bf16.msra.mxu1 %v3342_v40  ;;  %v2974_v40 = vld [vmem:[%s3833_s13 + $0x38] sm:$0xff]  ;;  %s3544_s13 = scalar_lea.vmem %s3543_s10, 4096 }
  0xa4   : > { %3091 = vmatprep.subr.bf16.mxu1 %v3632_v4  ;;  %2552 = vperm.xlu1 %3303, %v2974_v40   ;;  %p3546_p5 = scmp.lt.s32.totalorder %s3544_s13, %s3538_s6 }
  0xa5   : > { %811 = vmatpush1.bf16.msra.mxu0 %v3900_v28 }
  0xa6   : > { %1073 = vmatprep.subr.bf16.mxu0 %v3844_v2  ;;  %p3547_p9 = por %p3546_p5, %p3545_p0 }
  0xa7   : > { %3092 = vmatpush3.bf16.msra.mxu1 %v3343_v41  ;;  %v2767_v41 = vld [vmem:[%s3818_s27 + $0x18] sm:$0xff] }
  0xa8   : > { %3097 = vmatprep.subr.bf16.mxu1 %v3632_v4  ;;  %p3548_p1 = pnand %p3547_p9, %p3541_p13 }
  0xea   : > { %v615_v12 = vpop.permute.xlu0 %614 }
 0x15b   : > { %v555_v43 = vpop.f32.mrb[0].mxu0 }
 0x15c   : > { %v556_v44 = vadd.f32 %v555_v43, %v390_v42  ;;  %v557_v45 = vpop.f32.mrb[1].mxu0 }
 0x15d   : > { %v559_v47 = vpop.f32.mrb[2].mxu0  ;;  %v558_v50 = vadd.f32 %v557_v45, %v391_v46  ;;  %v596_v51 = vpop.f32.mrb[0].mxu1 }
 0x15e   : > { %v602_v48 = vmul.f32 0.5, %v556_v44  ;;  %v560_v49 = vpop.f32.mrb[3].mxu0  ;;  %v3075_v53 = vpop.f32.mrb[1].mxu1  ;;  %v597_v56 = vadd.f32 %v596_v51, %v392_v52  ;;  %v2768_v47 = vld [vmem:[%s3818_s27 + $0x20] sm:$0xff] }
 0x15f   : > { %v599_v54 = vpop.f32.mrb[2].mxu1 }
 0x160   : > { %3416 = vtanh.f32 %v602_v48  ;;  %v3076_v55 = vpop.f32.mrb[3].mxu1  ;;  %v619_v57 = vmul.f32 0.5, %v597_v56  ;;  %v2769_v54 = vld [vmem:[%s3818_s27 + $0x28] sm:$0xff] }
 0x161   : > { %3418 = vtanh.f32 %v558_v50 }
 0x162   : > { %3420 = vtanh.f32 %v619_v57 }
 0x16a   : > { %v3417_v58 = vpop.eup %3416 }
 0x16b   : > { %v604_v59 = vmul.f32 0.5, %v3417_v58  ;;  %v3419_v61 = vpop.eup %3418 }
 0x16c   : > { %v3421_v18 = vpop.eup %3420 }
 0x16d   : > { %v605_v60 = vadd.f32 0.5, %v604_v59  ;;  %v621_v21 = vmul.f32 0.5, %v3421_v18 }
 0x16f   : > { %v606_v63 = vsub.f32 1.0, %v605_v60  ;;  %v609_v0 = vmul.f32 %v3419_v61, %v605_v60  ;;  %v622_v22 = vadd.f32 0.5, %v621_v21 }
 0x171   : > { %v607_v1 = vmul.f32 %v606_v63, %v356_v62 }
 0x173   : > { %v610_v10 = vadd.f32 %v609_v0, %v607_v1  ;;  %v891_v1 = vpop.permute.xlu0 %890 }
 0x175   : > { %v3941_v15 = vmul.f32 %v615_v12, %v610_v10 }
 0x177   : > { %3422 = vtanh.f32 %v3941_v15  ;;  %628 = vst [vmem:[%s3835_s28 + $0x8] sm:$0xff] %v3941_v15 }
 0x181   : > { %v3423_v23 = vpop.eup %3422 }
 0x182   : > { %v623_v26 = vmul.f32 %v3423_v23, %v622_v22 }
 0x184   : > { %v624_v27 = vmul.f32 %v623_v26, %v615_v12 }
 0x186   : > { %627 = vst [vmem:[%s3835_s28] sm:$0xff] %v624_v27  ;;  %v631_v29 = vpack.c.bf16 %v624_v27, %v624_v27 }
 0x188   : > { %829 = vmatmul.mubr.bf16.vlgmr.msra.gmra.mrb[4].mxu0 %v631_v29  ;;  %3094 = vmatmul.mubr.bf16.vlgmr.msra.gmra.mrb[4].mxu1 %v631_v29 }
 0x189   : > { %1074 = vmatpush1.bf16.msra.mxu0 %v3846_v3  ;;  %1105 = vmatprep.mubr.bf16.mxu0 %v3633_v5 }
 0x18a   : > { %1075 = vmatprep.subr.bf16.mxu0 %v3851_v6  ;;  %3113 = vmatprep.mubr.msk.bf16.mxu1 %vm3634_vm0, %v3632_v4 }
 0x18b   : > { %3098 = vmatpush3.bf16.msra.mxu1 %v3344_v30 }
 0x18c   : > { %3099 = vmatprep.subr.bf16.mxu1 %v3632_v4 }
 0x18d   : > { %1076 = vmatpush1.bf16.msra.mxu0 %v3856_v7 }
 0x18e   : > { %1077 = vmatprep.subr.bf16.mxu0 %v3860_v8 }
 0x18f   : > { %3100 = vmatpush3.bf16.msra.mxu1 %v3345_v31 }
 0x190   : > { %3101 = vmatprep.subr.bf16.mxu1 %v3632_v4 }
 0x191   : > { %1078 = vmatpush1.bf16.msra.mxu0 %v3863_v9 }
 0x192   : > { %1079 = vmatprep.subr.bf16.mxu0 %v3867_v11 }
 0x193   : > { %3102 = vmatpush3.bf16.msra.mxu1 %v3346_v32 }
 0x194   : > { %3103 = vmatprep.subr.bf16.mxu1 %v3632_v4 }
 0x195   : > { %1080 = vmatpush1.bf16.msra.mxu0 %v3871_v13 }
 0x196   : > { %1081 = vmatprep.subr.bf16.mxu0 %v3874_v14 }
 0x197   : > { %3104 = vmatpush3.bf16.msra.mxu1 %v3347_v33 }
 0x198   : > { %3105 = vmatprep.subr.bf16.mxu1 %v3632_v4 }
 0x199   : > { %1082 = vmatpush1.bf16.msra.mxu0 %v3878_v16 }
 0x19a   : > { %1083 = vmatprep.subr.bf16.mxu0 %v3881_v17 }
 0x19b   : > { %3106 = vmatpush3.bf16.msra.mxu1 %v3348_v34  ;;  %v2799_v34 = vld [vmem:[%s3818_s27 + $0x40] sm:$0xff] }
 0x19c   : > { %3107 = vmatprep.subr.bf16.mxu1 %v3632_v4 }
 0x19d   : > { %1084 = vmatpush1.bf16.msra.mxu0 %v3885_v19 }
 0x19e   : > { %1085 = vmatprep.subr.bf16.mxu0 %v3887_v20 }
 0x1a1   : > { %1086 = vmatpush1.bf16.msra.mxu0 %v3892_v24 }
 0x1a2   : > { %1087 = vmatprep.subr.bf16.mxu0 %v3894_v25 }
 0x1a5   : > { %1088 = vmatpush1.bf16.msra.mxu0 %v3900_v28 }
 0x1a6   : > { %1350 = vmatprep.subr.bf16.mxu0 %v3844_v2  ;;  %v3349_v2 = vld [vmem:[#allocation7 + $0x80] ss:$12 sps:$4 sm:$0xff]  }
 0x1a7   : > { %3108 = vmatpush3.bf16.msra.mxu1 %v3349_v2 }
 0x1a8   : > { %3109 = vmatprep.subr.bf16.mxu1 %v3632_v4 }
 0x1ab   : > { %3110 = vmatpush3.bf16.msra.mxu1 %v3350_v35 }
 0x1ac   : > { %3111 = vmatprep.subr.bf16.mxu1 %v3632_v4 }
 0x1af   : > { %3112 = vmatpush3.bf16.msra.mxu1 %v3351_v36 }
 0x1b0   : > { %3117 = vmatprep.subr.bf16.mxu1 %v3632_v4 }
 0x25b   : > { %v830_v42 = vpop.f32.mrb[4].mxu0  ;;  %v871_v43 = vpop.f32.mrb[4].mxu1 }
 0x25c   : > { %v831_v44 = vadd.f32 %v2767_v41, %v830_v42  ;;  %v832_v45 = vpop.f32.mrb[5].mxu0  ;;  %v3095_v46 = vpop.f32.mrb[5].mxu1  ;;  %v872_v55 = vadd.f32 %v2769_v54, %v871_v43  ;;  %v4029_v54 = vld [vmem:[#allocation7] ss:$12 sps:$4 sm:$0xff]  }
 0x25d   : > { %v834_v48 = vpop.f32.mrb[6].mxu0  ;;  %v874_v49 = vpop.f32.mrb[6].mxu1  ;;  %v833_v53 = vadd.f32 %v2768_v47, %v832_v45 }
 0x25e   : > { %v877_v50 = vmul.f32 0.5, %v831_v44  ;;  %v835_v51 = vpop.f32.mrb[7].mxu0  ;;  %v3096_v52 = vpop.f32.mrb[7].mxu1  ;;  %v895_v58 = vmul.f32 0.5, %v872_v55  ;;  %v3363_v55 = vld [vmem:[#allocation7 + $0x8] ss:$12 sps:$4 sm:$0xff]  }
 0x25f   : > { %v1168_v44 = vpop.permute.xlu1 %1167 }
 0x260   : > { %3424 = vtanh.f32 %v877_v50 }
 0x261   : > { %3426 = vtanh.f32 %v833_v53  ;;  %v4027_v53 = vld [vmem:[#allocation7 + $0x4] ss:$12 sps:$4 sm:$0xff]  }
 0x262   : > { %3428 = vtanh.f32 %v895_v58  ;;  %v3367_v58 = vld [vmem:[#allocation7 + $0x20] ss:$12 sps:$4 sm:$0xff]  }
 0x26a   : > { %v3425_v56 = vpop.eup %3424 }
 0x26b   : > { %v879_v57 = vmul.f32 0.5, %v3425_v56  ;;  %v3427_v60 = vpop.eup %3426  ;;  %v4033_v56 = vld [vmem:[#allocation7 + $0x1c] ss:$12 sps:$4 sm:$0xff]  }
 0x26c   : > { %v3429_v12 = vpop.eup %3428 }
 0x26d   : > { %v880_v59 = vadd.f32 0.5, %v879_v57  ;;  %v897_v18 = vmul.f32 0.5, %v3429_v12  ;;  %v4036_v57 = vld [vmem:[#allocation7 + $0x18] ss:$12 sps:$4 sm:$0xff]   ;;  %v3379_v12 = vld [vmem:[#allocation7 + $0x68] ss:$12 sps:$4 sm:$0xff]  }
 0x26f   : > { %v881_v61 = vsub.f32 1.0, %v880_v59  ;;  %v884_v62 = vmul.f32 %v3427_v60, %v880_v59  ;;  %v898_v21 = vadd.f32 0.5, %v897_v18  ;;  %v4040_v59 = vld [vmem:[#allocation7 + $0x34] ss:$12 sps:$4 sm:$0xff]   ;;  %v4043_v60 = vld [vmem:[#allocation7 + $0x30] ss:$12 sps:$4 sm:$0xff]  }
 0x270   : > { %v4061_v18 = vld [vmem:[#allocation7 + $0x7c] ss:$12 sps:$4 sm:$0xff]  }
 0x271   : > { %v882_v63 = vmul.f32 %v881_v61, %v3941_v15  ;;  %v3371_v61 = vld [vmem:[#allocation7 + $0x38] ss:$12 sps:$4 sm:$0xff]  }
 0x273   : > { %v885_v0 = vadd.f32 %v884_v62, %v882_v63  ;;  %v4047_v62 = vld [vmem:[#allocation7 + $0x4c] ss:$12 sps:$4 sm:$0xff]   ;;  %v4050_v63 = vld [vmem:[#allocation7 + $0x48] ss:$12 sps:$4 sm:$0xff]  }
 0x275   : > { %v3982_v10 = vmul.f32 %v891_v1, %v885_v0  ;;  %v3375_v0 = vld [vmem:[#allocation7 + $0x50] ss:$12 sps:$4 sm:$0xff]  }
 0x277   : > { %3430 = vtanh.f32 %v3982_v10  ;;  %2796 = vst [vmem:[%s3835_s28 + $0x18] sm:$0xff] %v3982_v10 }
 0x281   : > { %v3431_v22 = vpop.eup %3430 }
 0x282   : > { %v899_v23 = vmul.f32 %v3431_v22, %v898_v21  ;;  %v4064_v21 = vld [vmem:[#allocation7 + $0x78] ss:$12 sps:$4 sm:$0xff]   ;;  %v3383_v22 = vld [vmem:[#allocation7 + $0x80] ss:$12 sps:$4 sm:$0xff]  }
 0x284   : > { %v900_v26 = vmul.f32 %v899_v23, %v891_v1  ;;  %v4054_v1 = vld [vmem:[#allocation7 + $0x64] ss:$12 sps:$4 sm:$0xff]   ;;  %v4068_v23 = vld [vmem:[#allocation7 + $0x94] ss:$12 sps:$4 sm:$0xff]  }
 0x286   : > { %2795 = vst [vmem:[%s3835_s28 + $0x10] sm:$0xff] %v900_v26  ;;  %v908_v27 = vpack.c.bf16 %v900_v26, %v900_v26  ;;  %v4071_v26 = vld [vmem:[#allocation7 + $0x90] ss:$12 sps:$4 sm:$0xff]  }
 0x288   : > { %1106 = vmatmul.mubr.bf16.vlgmr.msra.gmra.mrb[8].mxu0 %v908_v27  ;;  %3114 = vmatmul.mubr.bf16.vlgmr.msra.gmra.mrb[8].mxu1 %v908_v27  ;;  %v3387_v27 = vld [vmem:[#allocation7 + $0x98] ss:$12 sps:$4 sm:$0xff]  }
 0x289   : > { %1351 = vmatpush1.bf16.msra.mxu0 %v3846_v3  ;;  %1382 = vmatprep.mubr.bf16.mxu0 %v3633_v5  ;;  %v3352_v3 = vld [vmem:[#allocation7 + $0x8] ss:$12 sps:$4 sm:$0xff]  }
 0x28a   : > { %1352 = vmatprep.subr.bf16.mxu0 %v3851_v6  ;;  %3133 = vmatprep.mubr.msk.bf16.mxu1 %vm3634_vm0, %v3632_v4  ;;  %v3353_v6 = vld [vmem:[#allocation7 + $0x20] ss:$12 sps:$4 sm:$0xff]  }
 0x28b   : > { %3118 = vmatpush3.bf16.msra.mxu1 %v3352_v3  ;;  %v4075_v3 = vld [vmem:[#allocation7 + $0xac] ss:$12 sps:$4 sm:$0xff]  }
 0x28c   : > { %3119 = vmatprep.subr.bf16.mxu1 %v3632_v4 }
 0x28d   : > { %1353 = vmatpush1.bf16.msra.mxu0 %v3856_v7  ;;  %v3354_v7 = vld [vmem:[#allocation7 + $0x38] ss:$12 sps:$4 sm:$0xff]  }
 0x28e   : > { %1354 = vmatprep.subr.bf16.mxu0 %v3860_v8  ;;  %v3355_v8 = vld [vmem:[#allocation7 + $0x50] ss:$12 sps:$4 sm:$0xff]  }
 0x28f   : > { %3120 = vmatpush3.bf16.msra.mxu1 %v3353_v6  ;;  %v4078_v6 = vld [vmem:[#allocation7 + $0xa8] ss:$12 sps:$4 sm:$0xff]  }
 0x290   : > { %3121 = vmatprep.subr.bf16.mxu1 %v3632_v4 }
 0x291   : > { %1355 = vmatpush1.bf16.msra.mxu0 %v3863_v9  ;;  %v3356_v9 = vld [vmem:[#allocation7 + $0x68] ss:$12 sps:$4 sm:$0xff]  }
 0x292   : > { %1356 = vmatprep.subr.bf16.mxu0 %v3867_v11  ;;  %v3357_v11 = vld [vmem:[#allocation7 + $0x80] ss:$12 sps:$4 sm:$0xff]  }
 0x293   : > { %3122 = vmatpush3.bf16.msra.mxu1 %v3354_v7  ;;  %v3391_v7 = vld [vmem:[#allocation7 + $0xb0] ss:$12 sps:$4 sm:$0xff]  }
 0x294   : > { %3123 = vmatprep.subr.bf16.mxu1 %v3632_v4 }
 0x295   : > { %1357 = vmatpush1.bf16.msra.mxu0 %v3871_v13  ;;  %v3358_v13 = vld [vmem:[#allocation7 + $0x98] ss:$12 sps:$4 sm:$0xff]  }
 0x296   : > { %1358 = vmatprep.subr.bf16.mxu0 %v3874_v14  ;;  %v3359_v14 = vld [vmem:[#allocation7 + $0xb0] ss:$12 sps:$4 sm:$0xff]  }
 0x297   : > { %3124 = vmatpush3.bf16.msra.mxu1 %v3355_v8  ;;  %v2827_v8 = vld [vmem:[%s3818_s27 + $0x48] sm:$0xff] }
 0x298   : > { %3125 = vmatprep.subr.bf16.mxu1 %v3632_v4 }
 0x299   : > { %1359 = vmatpush1.bf16.msra.mxu0 %v3878_v16  ;;  %v2797_v16 = vld [vmem:[%s3818_s27 + $0x30] sm:$0xff] }
 0x29a   : > { %1360 = vmatprep.subr.bf16.mxu0 %v3881_v17 }
 0x29b   : > { %3126 = vmatpush3.bf16.msra.mxu1 %v3356_v9 }
 0x29c   : > { %3127 = vmatprep.subr.bf16.mxu1 %v3632_v4 }
 0x29d   : > { %1361 = vmatpush1.bf16.msra.mxu0 %v3885_v19 }
 0x29e   : > { %1362 = vmatprep.subr.bf16.mxu0 %v3887_v20 }
 0x29f   : > { %3128 = vmatpush3.bf16.msra.mxu1 %v3357_v11 }
 0x2a0   : > { %3129 = vmatprep.subr.bf16.mxu1 %v3632_v4 }
 0x2a1   : > { %1363 = vmatpush1.bf16.msra.mxu0 %v3892_v24 }
 0x2a2   : > { %1364 = vmatprep.subr.bf16.mxu0 %v3894_v25 }
 0x2a3   : > { %3130 = vmatpush3.bf16.msra.mxu1 %v3358_v13 }
 0x2a4   : > { %3131 = vmatprep.subr.bf16.mxu1 %v3632_v4 }
 0x2a5   : > { %1365 = vmatpush1.bf16.msra.mxu0 %v3900_v28  ;;  %v2798_v28 = vld [vmem:[%s3818_s27 + $0x38] sm:$0xff] }
 0x2a6   : > { %1627 = vmatprep.subr.bf16.mxu0 %v4027_v53 }
 0x2a7   : > { %3132 = vmatpush3.bf16.msra.mxu1 %v3359_v14 }
 0x2a8   : > { %3137 = vmatprep.subr.bf16.mxu1 %v3632_v4 }
 0x35b   : > { %v1107_v17 = vpop.f32.mrb[8].mxu0  ;;  %v1148_v19 = vpop.f32.mrb[8].mxu1 }
 0x35c   : > { %v1108_v20 = vadd.f32 %v2797_v16, %v1107_v17  ;;  %v1109_v24 = vpop.f32.mrb[9].mxu0  ;;  %v3115_v25 = vpop.f32.mrb[9].mxu1  ;;  %v1149_v2 = vadd.f32 %v2799_v34, %v1148_v19  ;;  %v2828_v17 = vld [vmem:[%s3818_s27 + $0x50] sm:$0xff] }
 0x35d   : > { %v1111_v15 = vpop.f32.mrb[10].mxu0  ;;  %v1151_v29 = vpop.f32.mrb[10].mxu1  ;;  %v1110_v33 = vadd.f32 %v2798_v28, %v1109_v24 }
 0x35e   : > { %v1154_v30 = vmul.f32 0.5, %v1108_v20  ;;  %v1112_v31 = vpop.f32.mrb[11].mxu0  ;;  %v3116_v32 = vpop.f32.mrb[11].mxu1  ;;  %v1172_v37 = vmul.f32 0.5, %v1149_v2  ;;  %v2829_v29 = vld [vmem:[%s3818_s27 + $0x58] sm:$0xff] }
 0x360   : > { %3432 = vtanh.f32 %v1154_v30 }
 0x361   : > { %3434 = vtanh.f32 %v1110_v33 }
 0x362   : > { %3436 = vtanh.f32 %v1172_v37 }
 0x36a   : > { %v3433_v35 = vpop.eup %3432 }
 0x36b   : > { %v1156_v36 = vmul.f32 0.5, %v3433_v35  ;;  %v3435_v39 = vpop.eup %3434 }
 0x36c   : > { %v3437_v46 = vpop.eup %3436 }
 0x36d   : > { %v1157_v38 = vadd.f32 0.5, %v1156_v36  ;;  %v1174_v47 = vmul.f32 0.5, %v3437_v46 }
 0x36f   : > { %v1158_v40 = vsub.f32 1.0, %v1157_v38  ;;  %v1161_v41 = vmul.f32 %v3435_v39, %v1157_v38  ;;  %v1175_v48 = vadd.f32 0.5, %v1174_v47  ;;  %v1445_v39 = vpop.permute.xlu1 %1444 }
 0x371   : > { %v1159_v42 = vmul.f32 %v1158_v40, %v3982_v10  ;;  %v4057_v10 = vld [vmem:[#allocation7 + $0x60] ss:$12 sps:$4 sm:$0xff]  }
 0x373   : > { %v1162_v43 = vadd.f32 %v1161_v41, %v1159_v42 }
 0x375   : > { %v4018_v45 = vmul.f32 %v1168_v44, %v1162_v43 }
 0x377   : > { %3438 = vtanh.f32 %v4018_v45  ;;  %2826 = vst [vmem:[%s3835_s28 + $0x28] sm:$0xff] %v4018_v45 }
 0x381   : > { %v3439_v49 = vpop.eup %3438 }
 0x382   : > { %v1176_v50 = vmul.f32 %v3439_v49, %v1175_v48  ;;  %v3393_v49 = vld [vmem:[#allocation7 + $0x20] ss:$12 sps:$4 sm:$0xff]  }
 0x384   : > { %v1177_v51 = vmul.f32 %v1176_v50, %v1168_v44  ;;  %v3394_v50 = vld [vmem:[#allocation7 + $0x38] ss:$12 sps:$4 sm:$0xff]  }
 0x386   : > { %2825 = vst [vmem:[%s3835_s28 + $0x20] sm:$0xff] %v1177_v51  ;;  %v1185_v52 = vpack.c.bf16 %v1177_v51, %v1177_v51  ;;  %v3395_v51 = vld [vmem:[#allocation7 + $0x50] ss:$12 sps:$4 sm:$0xff]  }
 0x388   : > { %1383 = vmatmul.mubr.bf16.vlgmr.msra.gmra.mrb[12].mxu0 %v1185_v52  ;;  %3134 = vmatmul.mubr.bf16.vlgmr.msra.gmra.mrb[12].mxu1 %v1185_v52  ;;  %v3396_v52 = vld [vmem:[#allocation7 + $0x68] ss:$12 sps:$4 sm:$0xff]  }
 0x389   : > { %1659 = vmatprep.mubr.bf16.mxu0 %v3633_v5  ;;  %3153 = vmatprep.mubr.msk.bf16.mxu1 %vm3634_vm0, %v3632_v4 }
 0x38a   : > { %1628 = vmatpush1.bf16.msra.mxu0 %v4029_v54  ;;  %3138 = vmatpush3.bf16.msra.mxu1 %v3363_v55  ;;  %v3397_v55 = vld [vmem:[#allocation7 + $0x80] ss:$12 sps:$4 sm:$0xff]  }
 0x38b   : > { %3139 = vmatprep.subr.bf16.mxu1 %v3632_v4  ;;  %1629 = vmatprep.subr.bf16.mxu0 %v4033_v56 }
 0x38e   : > { %1630 = vmatpush1.bf16.msra.mxu0 %v4036_v57  ;;  %3140 = vmatpush3.bf16.msra.mxu1 %v3367_v58  ;;  %v3398_v58 = vld [vmem:[#allocation7 + $0x98] ss:$12 sps:$4 sm:$0xff]  }
 0x38f   : > { %3141 = vmatprep.subr.bf16.mxu1 %v3632_v4  ;;  %1631 = vmatprep.subr.bf16.mxu0 %v4040_v59 }
 0x392   : > { %1632 = vmatpush1.bf16.msra.mxu0 %v4043_v60  ;;  %3142 = vmatpush3.bf16.msra.mxu1 %v3371_v61  ;;  %v3399_v61 = vld [vmem:[#allocation7 + $0xb0] ss:$12 sps:$4 sm:$0xff]  }
 0x393   : > { %3143 = vmatprep.subr.bf16.mxu1 %v3632_v4  ;;  %1633 = vmatprep.subr.bf16.mxu0 %v4047_v62 }
 0x396   : > { %1634 = vmatpush1.bf16.msra.mxu0 %v4050_v63  ;;  %3144 = vmatpush3.bf16.msra.mxu1 %v3375_v0  ;;  %v2857_v0 = vld [vmem:[%s3818_s27 + $0x60] sm:$0xff] }
 0x397   : > { %3145 = vmatprep.subr.bf16.mxu1 %v3632_v4  ;;  %1635 = vmatprep.subr.bf16.mxu0 %v4054_v1 }
 0x39a   : > { %1636 = vmatpush1.bf16.msra.mxu0 %v4057_v10  ;;  %3146 = vmatpush3.bf16.msra.mxu1 %v3379_v12 }
 0x39b   : > { %3147 = vmatprep.subr.bf16.mxu1 %v3632_v4  ;;  %1637 = vmatprep.subr.bf16.mxu0 %v4061_v18 }
 0x39e   : > { %1638 = vmatpush1.bf16.msra.mxu0 %v4064_v21  ;;  %3148 = vmatpush3.bf16.msra.mxu1 %v3383_v22 }
 0x39f   : > { %3149 = vmatprep.subr.bf16.mxu1 %v3632_v4  ;;  %1639 = vmatprep.subr.bf16.mxu0 %v4068_v23 }
 0x3a2   : > { %1640 = vmatpush1.bf16.msra.mxu0 %v4071_v26  ;;  %3150 = vmatpush3.bf16.msra.mxu1 %v3387_v27 }
 0x3a3   : > { %3151 = vmatprep.subr.bf16.mxu1 %v3632_v4  ;;  %1641 = vmatprep.subr.bf16.mxu0 %v4075_v3 }
 0x3a6   : > { %1642 = vmatpush1.bf16.msra.mxu0 %v4078_v6  ;;  %3152 = vmatpush3.bf16.msra.mxu1 %v3391_v7 }
 0x3a7   : > { %1904 = vmatprep.subr.bf16.mxu0 %v4027_v53  ;;  %3157 = vmatprep.subr.bf16.mxu1 %v3632_v4 }
 0x45b   : > { %v1384_v9 = vpop.f32.mrb[12].mxu0  ;;  %v1425_v11 = vpop.f32.mrb[12].mxu1 }
 0x45c   : > { %v1385_v13 = vadd.f32 %v2827_v8, %v1384_v9  ;;  %v1386_v14 = vpop.f32.mrb[13].mxu0  ;;  %v3135_v16 = vpop.f32.mrb[13].mxu1  ;;  %v1426_v30 = vadd.f32 %v2829_v29, %v1425_v11  ;;  %v2858_v9 = vld [vmem:[%s3818_s27 + $0x68] sm:$0xff] }
 0x45d   : > { %v1388_v19 = vpop.f32.mrb[14].mxu0  ;;  %v1428_v20 = vpop.f32.mrb[14].mxu1  ;;  %v1387_v15 = vadd.f32 %v2828_v17, %v1386_v14 }
 0x45e   : > { %v1431_v24 = vmul.f32 0.5, %v1385_v13  ;;  %v1389_v25 = vpop.f32.mrb[15].mxu0  ;;  %v3136_v28 = vpop.f32.mrb[15].mxu1  ;;  %v1449_v33 = vmul.f32 0.5, %v1426_v30  ;;  %v2859_v20 = vld [vmem:[%s3818_s27 + $0x70] sm:$0xff] }
 0x460   : > { %3440 = vtanh.f32 %v1431_v24 }
 0x461   : > { %3442 = vtanh.f32 %v1387_v15 }
 0x462   : > { %3444 = vtanh.f32 %v1449_v33 }
 0x46a   : > { %v3441_v31 = vpop.eup %3440 }
 0x46b   : > { %v1433_v32 = vmul.f32 0.5, %v3441_v31  ;;  %v3443_v2 = vpop.eup %3442 }
 0x46c   : > { %v3445_v41 = vpop.eup %3444 }
 0x46d   : > { %v1434_v34 = vadd.f32 0.5, %v1433_v32  ;;  %v1451_v42 = vmul.f32 0.5, %v3445_v41 }
 0x46f   : > { %v1435_v35 = vsub.f32 1.0, %v1434_v34  ;;  %v1438_v36 = vmul.f32 %v3443_v2, %v1434_v34  ;;  %v1452_v43 = vadd.f32 0.5, %v1451_v42  ;;  %v1722_v2 = vpop.permute.xlu0 %1721 }
 0x471   : > { %v1436_v37 = vmul.f32 %v1435_v35, %v4018_v45  ;;  %v3392_v45 = vld [vmem:[#allocation7 + $0x8] ss:$12 sps:$4 sm:$0xff]  }
 0x473   : > { %v1439_v38 = vadd.f32 %v1438_v36, %v1436_v37 }
 0x475   : > { %v4088_v40 = vmul.f32 %v1445_v39, %v1439_v38 }
 0x477   : > { %3446 = vtanh.f32 %v4088_v40  ;;  %2856 = vst [vmem:[%s3835_s28 + $0x38] sm:$0xff] %v4088_v40 }
 0x481   : > { %v3447_v44 = vpop.eup %3446 }
 0x482   : > { %v1453_v46 = vmul.f32 %v3447_v44, %v1452_v43  ;;  %v3401_v44 = vld [vmem:[#allocation7 + $0x20] ss:$12 sps:$4 sm:$0xff]  }
 0x484   : > { %v1454_v47 = vmul.f32 %v1453_v46, %v1445_v39  ;;  %v3402_v46 = vld [vmem:[#allocation7 + $0x38] ss:$12 sps:$4 sm:$0xff]  }
 0x486   : > { %2855 = vst [vmem:[%s3835_s28 + $0x30] sm:$0xff] %v1454_v47  ;;  %v1462_v48 = vpack.c.bf16 %v1454_v47, %v1454_v47  ;;  %v3403_v47 = vld [vmem:[#allocation7 + $0x50] ss:$12 sps:$4 sm:$0xff]  }
 0x488   : > { %1660 = vmatmul.mubr.bf16.vlgmr.msra.gmra.mrb[16].mxu0 %v1462_v48  ;;  %3154 = vmatmul.mubr.bf16.vlgmr.msra.gmra.mrb[16].mxu1 %v1462_v48  ;;  %v3404_v48 = vld [vmem:[#allocation7 + $0x68] ss:$12 sps:$4 sm:$0xff]  }
 0x489   : > { %1905 = vmatpush1.bf16.msra.mxu0 %v4029_v54  ;;  %1936 = vmatprep.mubr.bf16.mxu0 %v3633_v5 }
 0x48a   : > { %1906 = vmatprep.subr.bf16.mxu0 %v4033_v56  ;;  %3173 = vmatprep.mubr.msk.bf16.mxu1 %vm3634_vm0, %v3632_v4 }
 0x48b   : > { %3158 = vmatpush3.bf16.msra.mxu1 %v3392_v45  ;;  %v3406_v45 = vld [vmem:[#allocation7 + $0x98] ss:$12 sps:$4 sm:$0xff]  }
 0x48c   : > { %3159 = vmatprep.subr.bf16.mxu1 %v3632_v4 }
 0x48d   : > { %1907 = vmatpush1.bf16.msra.mxu0 %v4036_v57 }
 0x48e   : > { %1908 = vmatprep.subr.bf16.mxu0 %v4040_v59 }
 0x48f   : > { %3160 = vmatpush3.bf16.msra.mxu1 %v3393_v49  ;;  %v3407_v49 = vld [vmem:[#allocation7 + $0xb0] ss:$12 sps:$4 sm:$0xff]  }
 0x490   : > { %3161 = vmatprep.subr.bf16.mxu1 %v3632_v4 }
 0x491   : > { %1909 = vmatpush1.bf16.msra.mxu0 %v4043_v60 }
 0x492   : > { %1910 = vmatprep.subr.bf16.mxu0 %v4047_v62 }
 0x493   : > { %3162 = vmatpush3.bf16.msra.mxu1 %v3394_v50  ;;  %v2887_v50 = vld [vmem:[%s3818_s27 + $0x78] sm:$0xff] }
 0x494   : > { %3163 = vmatprep.subr.bf16.mxu1 %v3632_v4 }
 0x495   : > { %1911 = vmatpush1.bf16.msra.mxu0 %v4050_v63 }
 0x496   : > { %1912 = vmatprep.subr.bf16.mxu0 %v4054_v1 }
 0x497   : > { %3164 = vmatpush3.bf16.msra.mxu1 %v3395_v51 }
 0x498   : > { %3165 = vmatprep.subr.bf16.mxu1 %v3632_v4 }
 0x499   : > { %1913 = vmatpush1.bf16.msra.mxu0 %v4057_v10 }
 0x49a   : > { %1914 = vmatprep.subr.bf16.mxu0 %v4061_v18 }
 0x49b   : > { %3166 = vmatpush3.bf16.msra.mxu1 %v3396_v52 }
 0x49c   : > { %3167 = vmatprep.subr.bf16.mxu1 %v3632_v4 }
 0x49d   : > { %1915 = vmatpush1.bf16.msra.mxu0 %v4064_v21 }
 0x49e   : > { %1916 = vmatprep.subr.bf16.mxu0 %v4068_v23 }
 0x49f   : > { %3168 = vmatpush3.bf16.msra.mxu1 %v3397_v55 }
 0x4a0   : > { %3169 = vmatprep.subr.bf16.mxu1 %v3632_v4 }
 0x4a1   : > { %1917 = vmatpush1.bf16.msra.mxu0 %v4071_v26 }
 0x4a2   : > { %1918 = vmatprep.subr.bf16.mxu0 %v4075_v3 }
 0x4a3   : > { %3170 = vmatpush3.bf16.msra.mxu1 %v3398_v58 }
 0x4a4   : > { %3171 = vmatprep.subr.bf16.mxu1 %v3632_v4 }
 0x4a5   : > { %1919 = vmatpush1.bf16.msra.mxu0 %v4078_v6 }
 0x4a6   : > { %2181 = vmatprep.subr.bf16.mxu0 %v4027_v53 }
 0x4a7   : > { %3172 = vmatpush3.bf16.msra.mxu1 %v3399_v61 }
 0x4a8   : > { %3177 = vmatprep.subr.bf16.mxu1 %v3632_v4 }
 0x55b   : > { %v1661_v12 = vpop.f32.mrb[16].mxu0  ;;  %v1702_v22 = vpop.f32.mrb[16].mxu1 }
 0x55c   : > { %v1662_v27 = vadd.f32 %v2857_v0, %v1661_v12  ;;  %v1663_v7 = vpop.f32.mrb[17].mxu0  ;;  %v3155_v8 = vpop.f32.mrb[17].mxu1  ;;  %v1703_v24 = vadd.f32 %v2859_v20, %v1702_v22  ;;  %v2888_v0 = vld [vmem:[%s3818_s27 + $0x80] sm:$0xff] }
 0x55d   : > { %v1665_v11 = vpop.f32.mrb[18].mxu0  ;;  %v1705_v13 = vpop.f32.mrb[18].mxu1  ;;  %v1664_v19 = vadd.f32 %v2858_v9, %v1663_v7 }
 0x55e   : > { %v1708_v14 = vmul.f32 0.5, %v1662_v27  ;;  %v1666_v16 = vpop.f32.mrb[19].mxu0  ;;  %v3156_v17 = vpop.f32.mrb[19].mxu1  ;;  %v1726_v15 = vmul.f32 0.5, %v1703_v24  ;;  %v2889_v11 = vld [vmem:[%s3818_s27 + $0x88] sm:$0xff] }
 0x560   : > { %3448 = vtanh.f32 %v1708_v14 }
 0x561   : > { %3450 = vtanh.f32 %v1664_v19 }
 0x562   : > { %3452 = vtanh.f32 %v1726_v15 }
 0x56a   : > { %v3449_v25 = vpop.eup %3448 }
 0x56b   : > { %v1710_v28 = vmul.f32 0.5, %v3449_v25  ;;  %v3451_v30 = vpop.eup %3450 }
 0x56c   : > { %v3453_v36 = vpop.eup %3452 }
 0x56d   : > { %v1711_v29 = vadd.f32 0.5, %v1710_v28  ;;  %v1728_v37 = vmul.f32 0.5, %v3453_v36 }
 0x56f   : > { %v1712_v31 = vsub.f32 1.0, %v1711_v29  ;;  %v1715_v32 = vmul.f32 %v3451_v30, %v1711_v29  ;;  %v1729_v38 = vadd.f32 0.5, %v1728_v37  ;;  %v1999_v29 = vpop.permute.xlu1 %1998 }
 0x571   : > { %v1713_v33 = vmul.f32 %v1712_v31, %v4088_v40  ;;  %v3400_v40 = vld [vmem:[#allocation7 + $0x8] ss:$12 sps:$4 sm:$0xff]  }
 0x573   : > { %v1716_v34 = vadd.f32 %v1715_v32, %v1713_v33 }
 0x575   : > { %v4125_v35 = vmul.f32 %v1722_v2, %v1716_v34 }
 0x577   : > { %3454 = vtanh.f32 %v4125_v35  ;;  %2886 = vst [vmem:[%s3835_s28 + $0x48] sm:$0xff] %v4125_v35 }
 0x581   : > { %v3455_v39 = vpop.eup %3454 }
 0x582   : > { %v1730_v41 = vmul.f32 %v3455_v39, %v1729_v38 }
 0x584   : > { %v1731_v42 = vmul.f32 %v1730_v41, %v1722_v2 }
 0x586   : > { %2885 = vst [vmem:[%s3835_s28 + $0x40] sm:$0xff] %v1731_v42  ;;  %v1739_v43 = vpack.c.bf16 %v1731_v42, %v1731_v42 }
 0x588   : > { %1937 = vmatmul.mubr.bf16.vlgmr.msra.gmra.mrb[20].mxu0 %v1739_v43  ;;  %3174 = vmatmul.mubr.bf16.vlgmr.msra.gmra.mrb[20].mxu1 %v1739_v43  ;;  %v2919_v43 = vld [vmem:[%s3818_s27 + $0xa0] sm:$0xff] }
 0x589   : > { %2182 = vmatpush1.bf16.msra.mxu0 %v4029_v54  ;;  %2213 = vmatprep.mubr.bf16.mxu0 %v3633_v5 }
 0x58a   : > { %2183 = vmatprep.subr.bf16.mxu0 %v4033_v56  ;;  %3193 = vmatprep.mubr.msk.bf16.mxu1 %vm3634_vm0, %v3632_v4 }
 0x58b   : > { %3178 = vmatpush3.bf16.msra.mxu1 %v3400_v40 }
 0x58c   : > { %3179 = vmatprep.subr.bf16.mxu1 %v3632_v4 }
 0x58d   : > { %2184 = vmatpush1.bf16.msra.mxu0 %v4036_v57 }
 0x58e   : > { %2185 = vmatprep.subr.bf16.mxu0 %v4040_v59 }
 0x58f   : > { %3180 = vmatpush3.bf16.msra.mxu1 %v3401_v44 }
 0x590   : > { %3181 = vmatprep.subr.bf16.mxu1 %v3632_v4 }
 0x591   : > { %2186 = vmatpush1.bf16.msra.mxu0 %v4043_v60 }
 0x592   : > { %2187 = vmatprep.subr.bf16.mxu0 %v4047_v62 }
 0x593   : > { %3182 = vmatpush3.bf16.msra.mxu1 %v3402_v46 }
 0x594   : > { %3183 = vmatprep.subr.bf16.mxu1 %v3632_v4 }
 0x595   : > { %2188 = vmatpush1.bf16.msra.mxu0 %v4050_v63 }
 0x596   : > { %2189 = vmatprep.subr.bf16.mxu0 %v4054_v1 }
 0x597   : > { %3184 = vmatpush3.bf16.msra.mxu1 %v3403_v47 }
 0x598   : > { %3185 = vmatprep.subr.bf16.mxu1 %v3632_v4 }
 0x599   : > { %2190 = vmatpush1.bf16.msra.mxu0 %v4057_v10 }
 0x59a   : > { %2191 = vmatprep.subr.bf16.mxu0 %v4061_v18 }
 0x59b   : > { %3186 = vmatpush3.bf16.msra.mxu1 %v3404_v48 }
 0x59c   : > { %3187 = vmatprep.subr.bf16.mxu1 %v3632_v4 }
 0x59d   : > { %2192 = vmatpush1.bf16.msra.mxu0 %v4064_v21 }
 0x59e   : > { %2193 = vmatprep.subr.bf16.mxu0 %v4068_v23 }
 0x5a1   : > { %2194 = vmatpush1.bf16.msra.mxu0 %v4071_v26 }
 0x5a2   : > { %2195 = vmatprep.subr.bf16.mxu0 %v4075_v3 }
 0x5a5   : > { %2196 = vmatpush1.bf16.msra.mxu0 %v4078_v6 }
 0x5a6   : > { %2458 = vmatprep.subr.bf16.mxu0 %v4027_v53  ;;  %v3405_v53 = vld [vmem:[#allocation7 + $0x80] ss:$12 sps:$4 sm:$0xff]  }
 0x5a7   : > { %3188 = vmatpush3.bf16.msra.mxu1 %v3405_v53 }
 0x5a8   : > { %3189 = vmatprep.subr.bf16.mxu1 %v3632_v4 }
 0x5ab   : > { %3190 = vmatpush3.bf16.msra.mxu1 %v3406_v45 }
 0x5ac   : > { %3191 = vmatprep.subr.bf16.mxu1 %v3632_v4 }
 0x5af   : > { %3192 = vmatpush3.bf16.msra.mxu1 %v3407_v49 }
 0x5b0   : > { %3197 = vmatprep.subr.bf16.mxu1 %v3632_v4 }
 0x65b   : > { %v1938_v51 = vpop.f32.mrb[20].mxu0  ;;  %v1979_v52 = vpop.f32.mrb[20].mxu1 }
 0x65c   : > { %v1939_v55 = vadd.f32 %v2887_v50, %v1938_v51  ;;  %v1940_v58 = vpop.f32.mrb[21].mxu0  ;;  %v3175_v61 = vpop.f32.mrb[21].mxu1  ;;  %v1980_v13 = vadd.f32 %v2889_v11, %v1979_v52 }
 0x65d   : > { %v1942_v12 = vpop.f32.mrb[22].mxu0  ;;  %v1982_v22 = vpop.f32.mrb[22].mxu1  ;;  %v1941_v9 = vadd.f32 %v2888_v0, %v1940_v58 }
 0x65e   : > { %v1985_v27 = vmul.f32 0.5, %v1939_v55  ;;  %v1943_v7 = vpop.f32.mrb[23].mxu0  ;;  %v3176_v8 = vpop.f32.mrb[23].mxu1  ;;  %v2003_v17 = vmul.f32 0.5, %v1980_v13 }
 0x65f   : > { %v2276_v51 = vpop.permute.xlu0 %2275  ;;  %v2947_v7 = vld [vmem:[%s3818_s27 + $0xa8] sm:$0xff] }
 0x660   : > { %3456 = vtanh.f32 %v1985_v27 }
 0x661   : > { %3458 = vtanh.f32 %v1941_v9 }
 0x662   : > { %3460 = vtanh.f32 %v2003_v17 }
 0x66a   : > { %v3457_v14 = vpop.eup %3456 }
 0x66b   : > { %v1987_v16 = vmul.f32 0.5, %v3457_v14  ;;  %v3459_v20 = vpop.eup %3458 }
 0x66c   : > { %v3461_v31 = vpop.eup %3460 }
 0x66d   : > { %v1988_v19 = vadd.f32 0.5, %v1987_v16  ;;  %v2005_v32 = vmul.f32 0.5, %v3461_v31  ;;  %v2948_v16 = vld [vmem:[%s3818_s27 + $0xb0] sm:$0xff] }
 0x66f   : > { %v1989_v24 = vsub.f32 1.0, %v1988_v19  ;;  %v1992_v25 = vmul.f32 %v3459_v20, %v1988_v19  ;;  %v2006_v33 = vadd.f32 0.5, %v2005_v32 }
 0x671   : > { %v1990_v28 = vmul.f32 %v1989_v24, %v4125_v35 }
 0x673   : > { %v1993_v15 = vadd.f32 %v1992_v25, %v1990_v28 }
 0x675   : > { %v4162_v30 = vmul.f32 %v1999_v29, %v1993_v15  ;;  %v2949_v15 = vld [vmem:[%s3818_s27 + $0xb8] sm:$0xff] }
 0x677   : > { %3462 = vtanh.f32 %v4162_v30  ;;  %2916 = vst [vmem:[%s3835_s28 + $0x58] sm:$0xff] %v4162_v30 }
 0x681   : > { %v3463_v34 = vpop.eup %3462 }
 0x682   : > { %v2007_v2 = vmul.f32 %v3463_v34, %v2006_v33 }
 0x684   : > { %v2008_v36 = vmul.f32 %v2007_v2, %v1999_v29 }
 0x686   : > { %2915 = vst [vmem:[%s3835_s28 + $0x50] sm:$0xff] %v2008_v36  ;;  %v2016_v37 = vpack.c.bf16 %v2008_v36, %v2008_v36 }
 0x688   : > { %2214 = vmatmul.mubr.bf16.vlgmr.msra.gmra.mrb[24].mxu0 %v2016_v37  ;;  %3194 = vmatmul.mubr.bf16.vlgmr.msra.gmra.mrb[24].mxu1 %v2016_v37 }
 0x689   : > { %2459 = vmatpush1.bf16.msra.mxu0 %v4029_v54  ;;  %2490 = vmatprep.mubr.bf16.mxu0 %v3633_v5  ;;  %v3408_v5 = vld [vmem:[#allocation7 + $0x8] ss:$12 sps:$4 sm:$0xff]   ;;  %v3409_v54 = vld [vmem:[#allocation7 + $0x20] ss:$12 sps:$4 sm:$0xff]  }
 0x68a   : > { %2460 = vmatprep.subr.bf16.mxu0 %v4033_v56  ;;  %3213 = vmatprep.mubr.msk.bf16.mxu1 %vm3634_vm0, %v3632_v4  ;;  %v3410_v56 = vld [vmem:[#allocation7 + $0x38] ss:$12 sps:$4 sm:$0xff]  }
 0x68b   : > { %3198 = vmatpush3.bf16.msra.mxu1 %v3408_v5 }
 0x68c   : > { %3199 = vmatprep.subr.bf16.mxu1 %v3632_v4 }
 0x68d   : > { %2461 = vmatpush1.bf16.msra.mxu0 %v4036_v57  ;;  %v3411_v57 = vld [vmem:[#allocation7 + $0x50] ss:$12 sps:$4 sm:$0xff]  }
 0x68e   : > { %2462 = vmatprep.subr.bf16.mxu0 %v4040_v59  ;;  %v3412_v59 = vld [vmem:[#allocation7 + $0x68] ss:$12 sps:$4 sm:$0xff]  }
 0x68f   : > { %3200 = vmatpush3.bf16.msra.mxu1 %v3409_v54  ;;  %v2553_v54 = vpop.permute.xlu1 %2552 }
 0x690   : > { %3201 = vmatprep.subr.bf16.mxu1 %v3632_v4 }
 0x691   : > { %2463 = vmatpush1.bf16.msra.mxu0 %v4043_v60  ;;  %v3413_v60 = vld [vmem:[#allocation7 + $0x80] ss:$12 sps:$4 sm:$0xff]  }
 0x692   : > { %2464 = vmatprep.subr.bf16.mxu0 %v4047_v62  ;;  %v3414_v62 = vld [vmem:[#allocation7 + $0x98] ss:$12 sps:$4 sm:$0xff]  }
 0x693   : > { %3202 = vmatpush3.bf16.msra.mxu1 %v3410_v56 }
 0x694   : > { %3203 = vmatprep.subr.bf16.mxu1 %v3632_v4 }
 0x695   : > { %2465 = vmatpush1.bf16.msra.mxu0 %v4050_v63  ;;  %v3415_v63 = vld [vmem:[#allocation7 + $0xb0] ss:$12 sps:$4 sm:$0xff]  }
 0x696   : > { %2466 = vmatprep.subr.bf16.mxu0 %v4054_v1  ;;  %v2917_v1 = vld [vmem:[%s3818_s27 + $0x90] sm:$0xff] }
 0x697   : > { %3204 = vmatpush3.bf16.msra.mxu1 %v3411_v57 }
 0x698   : > { %3205 = vmatprep.subr.bf16.mxu1 %v3632_v4 }
 0x699   : > { %2467 = vmatpush1.bf16.msra.mxu0 %v4057_v10 }
 0x69a   : > { %2468 = vmatprep.subr.bf16.mxu0 %v4061_v18 }
 0x69b   : > { %3206 = vmatpush3.bf16.msra.mxu1 %v3412_v59 }
 0x69c   : > { %3207 = vmatprep.subr.bf16.mxu1 %v3632_v4 }
 0x69d   : > { %2469 = vmatpush1.bf16.msra.mxu0 %v4064_v21 }
 0x69e   : > { %2470 = vmatprep.subr.bf16.mxu0 %v4068_v23 }
 0x69f   : > { %3208 = vmatpush3.bf16.msra.mxu1 %v3413_v60 }
 0x6a0   : > { %3209 = vmatprep.subr.bf16.mxu1 %v3632_v4 }
 0x6a1   : > { %2471 = vmatpush1.bf16.msra.mxu0 %v4071_v26 }
 0x6a2   : > { %2472 = vmatprep.subr.bf16.mxu0 %v4075_v3  ;;  %v2918_v3 = vld [vmem:[%s3818_s27 + $0x98] sm:$0xff] }
 0x6a3   : > { %3210 = vmatpush3.bf16.msra.mxu1 %v3414_v62 }
 0x6a4   : > { %3211 = vmatprep.subr.bf16.mxu1 %v3632_v4 }
 0x6a5   : > { %2473 = vmatpush1.bf16.msra.mxu0 %v4078_v6 }
 0x6a7   : > { %3212 = vmatpush3.bf16.msra.mxu1 %v3415_v63 }
 0x75b   : > { %v2215_v10 = vpop.f32.mrb[24].mxu0  ;;  %v2256_v18 = vpop.f32.mrb[24].mxu1 }
 0x75c   : > { %v2216_v21 = vadd.f32 %v2917_v1, %v2215_v10  ;;  %v2217_v23 = vpop.f32.mrb[25].mxu0  ;;  %v3195_v26 = vpop.f32.mrb[25].mxu1  ;;  %v2257_v4 = vadd.f32 %v2919_v43, %v2256_v18 }
 0x75d   : > { %v2219_v6 = vpop.f32.mrb[26].mxu0  ;;  %v2259_v35 = vpop.f32.mrb[26].mxu1  ;;  %v2218_v42 = vadd.f32 %v2918_v3, %v2217_v23 }
 0x75e   : > { %v2262_v38 = vmul.f32 0.5, %v2216_v21  ;;  %v2220_v39 = vpop.f32.mrb[27].mxu0  ;;  %v3196_v41 = vpop.f32.mrb[27].mxu1  ;;  %v2280_v46 = vmul.f32 0.5, %v2257_v4 }
 0x760   : > { %3464 = vtanh.f32 %v2262_v38 }
 0x761   : > { %3466 = vtanh.f32 %v2218_v42 }
 0x762   : > { %3468 = vtanh.f32 %v2280_v46 }
 0x76a   : > { %v3465_v40 = vpop.eup %3464 }
 0x76b   : > { %v2264_v44 = vmul.f32 0.5, %v3465_v40  ;;  %v3467_v48 = vpop.eup %3466 }
 0x76c   : > { %v3469_v55 = vpop.eup %3468 }
 0x76d   : > { %v2265_v47 = vadd.f32 0.5, %v2264_v44  ;;  %v2282_v58 = vmul.f32 0.5, %v3469_v55 }
 0x76f   : > { %v2266_v53 = vsub.f32 1.0, %v2265_v47  ;;  %v2269_v45 = vmul.f32 %v3467_v48, %v2265_v47  ;;  %v2283_v61 = vadd.f32 0.5, %v2282_v58 }
 0x771   : > { %v2267_v49 = vmul.f32 %v2266_v53, %v4162_v30 }
 0x773   : > { %v2270_v50 = vadd.f32 %v2269_v45, %v2267_v49 }
 0x775   : > { %v2278_v52 = vmul.f32 %v2276_v51, %v2270_v50 }
 0x777   : > { %3470 = vtanh.f32 %v2278_v52  ;;  %2946 = vst [vmem:[%s3835_s28 + $0x68] sm:$0xff] %v2278_v52 }
 0x781   : > { %v3471_v0 = vpop.eup %3470 }
 0x782   : > { %v2284_v12 = vmul.f32 %v3471_v0, %v2283_v61 }
 0x784   : > { %v2285_v22 = vmul.f32 %v2284_v12, %v2276_v51 }
 0x786   : > { %2945 = vst [vmem:[%s3835_s28 + $0x60] sm:$0xff] %v2285_v22  ;;  %v2293_v27 = vpack.c.bf16 %v2285_v22, %v2285_v22 }
 0x788   : > { %2491 = vmatmul.mubr.bf16.vlgmr.msra.gmra.mrb[28].mxu0 %v2293_v27  ;;  %3214 = vmatmul.mubr.bf16.vlgmr.msra.gmra.mrb[28].mxu1 %v2293_v27 }
 0x85b   : > { %v2492_v8 = vpop.f32.mrb[28].mxu0  ;;  %v2533_v9 = vpop.f32.mrb[28].mxu1 }
 0x85c   : > { %v2493_v11 = vadd.f32 %v2947_v7, %v2492_v8  ;;  %v2494_v13 = vpop.f32.mrb[29].mxu0  ;;  %v3215_v14 = vpop.f32.mrb[29].mxu1  ;;  %v2534_v29 = vadd.f32 %v2949_v15, %v2533_v9 }
 0x85d   : > { %v2496_v17 = vpop.f32.mrb[30].mxu0  ;;  %v2536_v19 = vpop.f32.mrb[30].mxu1  ;;  %v2495_v28 = vadd.f32 %v2948_v16, %v2494_v13 }
 0x85e   : > { %v2539_v20 = vmul.f32 0.5, %v2493_v11  ;;  %v2497_v24 = vpop.f32.mrb[31].mxu0  ;;  %v3216_v25 = vpop.f32.mrb[31].mxu1  ;;  %v2557_v32 = vmul.f32 0.5, %v2534_v29 }
 0x860   : > { %3472 = vtanh.f32 %v2539_v20 }
 0x861   : > { %3474 = vtanh.f32 %v2495_v28 }
 0x862   : > { %3476 = vtanh.f32 %v2557_v32 }
 0x86a   : > { %v3473_v30 = vpop.eup %3472 }
 0x86b   : > { %v2541_v31 = vmul.f32 0.5, %v3473_v30  ;;  %v3475_v34 = vpop.eup %3474 }
 0x86c   : > { %v3477_v57 = vpop.eup %3476 }
 0x86d   : > { %v2542_v33 = vadd.f32 0.5, %v2541_v31  ;;  %v2559_v59 = vmul.f32 0.5, %v3477_v57 }
 0x86f   : > { %v2543_v2 = vsub.f32 1.0, %v2542_v33  ;;  %v2546_v36 = vmul.f32 %v3475_v34, %v2542_v33  ;;  %v2560_v60 = vadd.f32 0.5, %v2559_v59 }
 0x871   : > { %v2544_v37 = vmul.f32 %v2543_v2, %v2278_v52 }
 0x873   : > { %v2547_v5 = vadd.f32 %v2546_v36, %v2544_v37 }
 0x875   : > { %v2555_v56 = vmul.f32 %v2553_v54, %v2547_v5 }
 0x877   : > { %3478 = vtanh.f32 %v2555_v56  ;;  %2564 = vst [vmem:[#allocation3] sm:$0xff] %v2555_v56  ;;  %2976 = vst [vmem:[%s3835_s28 + $0x78] sm:$0xff] %v2555_v56 }
 0x881   : > { %v3479_v62 = vpop.eup %3478 }
 0x882   : > { %v2561_v63 = vmul.f32 %v3479_v62, %v2560_v60 }
 0x884   : > { %v2562_v1 = vmul.f32 %v2561_v63, %v2553_v54 }
 0x886   : > { %2563 = vst [vmem:[#allocation2] sm:$0xff] %v2562_v1  ;;  %2975 = vst [vmem:[%s3835_s28 + $0x70] sm:$0xff] %v2562_v1 }
 0x887   : > { %3551 = shalt.err (!%p3548_p1)
}
 0x888   : > { %s3552_s28 = scalar_lea.hbm %s4208_s17, 2048  ;;  %s3556_s11 = scalar_lea.hbm %s4265_s5, 4096 }
 0x889   : > { %p3553_p2 = scmp.ne.s32.totalorder %s4208_s17, %s3552_s28  ;;  %p3557_p11 = scmp.lt.u32.totalorder %s4208_s17, %s4265_s5 }
 0x88a   : > { %p3558_p4 = scmp.lt.u32.totalorder %s3556_s11, %s3552_s28  ;;  %p3560_p8 = scmp.lt.u32.totalorder %s3552_s28, %s4208_s17 }
 0x88b   : > { %p3554_p3 = pnand %p3553_p2, %p3760_p10 }
 0x88c   : > { %p3559_p6 = por %p3558_p4, %p3557_p11 }
 0x88d   : > { %p3555_p7 = pneg %p3554_p3 }
 0x88e   : > { %p3561_p12 = por %p3560_p8, %p3559_p6 }
 0x890   : > { %p3562_p13 = pnand %p3561_p12, %p3555_p7 }
 0x892   : > { %3565 = shalt.err (!%p3562_p13)
}
 0x893   : > { %s3636_s27 = smov 256   ;;  %s3637_s30 = smov 16  }
 0x894   : > { %3226 = dma.vmem_to_hbm [thread:$0]  (%p3760_p10), %s4210_s8, 2048, %s4208_s17, %s2569_s24, %s3636_s27, %s3636_s27, %s3637_s30  }
 0x895 PF: > { %s2600_s6 = sand.u32 1, %s3604_s18   ;;  %p4282_p0 = scmp.ne.s32.totalorder %s4273_s29, 0 }
 0x896   : > { %p4283_p5 = scmp.ge.s32.totalorder %s3624_s23, 2  ;;  %s2601_s21 = scalar_lea.sflag [#allocation6], %s2600_s6 }
 0x898   : > { %p3237_p9 = pnand %p4283_p5, %p4282_p0 }
 0x89a   : > { %3599 = dma.done.wait (!%p3237_p9), %s2601_s21, 2048  }
 0x89b   : > { %3601 = vsyncadd (!%p3237_p9), %s2601_s21, 4294965248  ;;  %s22_s23 = sadd.s32 1, %s3624_s23   ;;  %s4284_s18 = smov %s3608_s19 }
 0x89c   : > { %p19_p1 = scmp.ge.s32.totalorder %s22_s23, 4   ;;  %s4285_s19 = smov %s3612_s20 }
 0x89d   : > { %s4286_s20 = smov %s3769_s15  ;;  %s4287_s21 = smov %s3620_s22 }
 0x89e   : > { %s4288_s22 = smov %s4290_s9  ;;  %21 = sbr.rel (!%p19_p1) target bundleno = 7 (0x7), region = 123 }
 0x8a5   :  { %2606 = vsyncpa [#allocation5], 1 }
 0x8a6   :  { %2608 = vsyncpa [#allocation5 + $0x1], 1 }
 0x8a7   :  { %2609 = vsyncpa [#allocation8], 1 }
 0x8a8   :  { %2610 = vsyncpa [#allocation6], 1 }
 0x8a9   :  { %2612 = vsyncpa [#allocation6 + $0x1], 1 }

</bundles_post_ra>
